<compile_context>
chip_gen: v7x
topology: tpu7x:2x2x1
jax: 0.10.0
libtpu: 0.0.40
codegen_flags: <defaults>
</compile_context>

<pallas_src>
import math
from functools import partial

import numpy as np
import jax
import jax.numpy as jnp
from jax.experimental import pallas as pl
from jax.experimental.pallas import tpu as pltpu


_ACTS = {
    "silu": jax.nn.silu,
    "tanh": jnp.tanh,
    "relu": lambda x: jnp.maximum(x, 0.0),
    "lrelu": lambda x: jnp.where(x >= 0, x, 0.01 * x),   # nn.LeakyReLU default slope
    "eye": lambda x: x,
}


def _int2pair(v):
    return (v, v) if isinstance(v, int) else tuple(v)


def _layer_plan(in_channels, H, W, hidden_channels, kernel_size, stride, padding,
                dilation):
    """Static per-layer geometry of the flattened activation maps.

    Entry: (C_in, C_out, Hv, Wv, Wf_in, Hp, Wp, Wf, OH, OW) with
      (Hv, Wv) valid input size, Wf_in input lane row-stride,
      (Hp, Wp) post-padding size, Wf working/output row-stride,
      (OH, OW) valid output size.
    """
    KH, KW = kernel_size
    sh, sw = stride
    ph, pw = padding
    dh, dw = dilation
    C, Hv, Wv, Wf = in_channels, H, W, W
    plan = []
    for C_out in hidden_channels:
        if ph or pw:
            Hp, Wp = Hv + 2 * ph, Wv + 2 * pw
            Wfw = Wp
        else:
            Hp, Wp, Wfw = Hv, Wv, Wf
        OH = (Hp - dh * (KH - 1) - 1) // sh + 1
        OW = (Wp - dw * (KW - 1) - 1) // sw + 1
        plan.append((C, C_out, Hv, Wv, Wf, Hp, Wp, Wfw, OH, OW))
        C, Hv, Wv, Wf = C_out, OH, OW, Wfw
    return tuple(plan)


# --------------------------------- Pallas kernel ---------------------------------
def _bcnn_fused_kernel(*refs, plan, kernel_size, stride, dilation, padding,
                       activation, n_samps, out_pad):
    # refs = (x_ref, w_l0, b_l0, w_l1, b_l1, ..., o_ref); one grid point == one seed.
    # x_ref : (1, N, C0, H0*W0)        flattened input maps for this seed
    # w_l   : (1, KH*KW, C_out, C_in)  per-tap weight matrices
    # b_l   : (1, C_out, 1)
    # o_ref : (1, N, C_last, out_pad)  lane-dense flattened output
    x_ref, o_ref = refs[0], refs[-1]
    wb = refs[1:-1]
    KH, KW = kernel_size
    sh, _ = stride
    ph, pw = padding
    dh, dw = dilation
    N = n_samps
    act = _ACTS[activation]

    # Per-sample flattened activation maps, resident in VMEM for the whole stack.
    hs = [x_ref[0, n].astype(jnp.float32) for n in range(N)]

    for li, (C_in, C_out, Hv, Wv, Wf_in, Hp, Wp, Wf, OH, OW) in enumerate(plan):
        w_taps = wb[2 * li][0]        # (KH*KW, C_out, C_in)
        b = wb[2 * li + 1][0]         # (C_out, 1)
        span_out = (OH - 1) * Wf + OW

        new_hs = []
        for n in range(N):
            hn = hs[n]                # (C_in, span_in), row stride Wf_in, valid (Hv, Wv)
            if ph or pw:
                # General-padding fallback: densify -> pad -> re-flatten.
                # TODO(synk): only traced when padding != (0, 0).
                full = Hv * Wf_in
                if hn.shape[1] < full:
                    hn = jnp.concatenate(
                        [hn, jnp.zeros((C_in, full - hn.shape[1]), hn.dtype)], axis=1)
                img = hn.reshape(C_in, Hv, Wf_in)[:, :, :Wv]
                img = jnp.pad(img, ((0, 0), (ph, ph), (pw, pw)))
                hn = img.reshape(C_in, Hp * Wp)

            # Shifted-slice accumulation: one small MXU matmul per kernel tap, all in VMEM.
            acc = None
            for i in range(KH):
                for j in range(KW):
                    base = i * dh * Wf + j * dw
                    if sh == 1:
                        tap = hn[:, base:base + span_out]
                    else:
                        tap = hn[:, base:base + sh * (span_out - 1) + 1:sh]
                    part = jnp.dot(w_taps[i * KW + j], tap,
                                   preferred_element_type=jnp.float32)
                    acc = part if acc is None else acc + part
            new_hs.append(act(acc + b))            # (C_out, span_out), f32
        hs = new_hs

    # Lane-dense store: pad each sample's flat map up to a 128-multiple lane width.
    span_last = hs[0].shape[1]
    for n in range(N):
        t = hs[n]
        if out_pad > span_last:
            t = jnp.concatenate(
                [t, jnp.zeros((t.shape[0], out_pad - span_last), t.dtype)], axis=1)
        o_ref[0, n] = t.astype(o_ref.dtype)


# ------------------------------------ wrapper -------------------------------------
def bcnn2d_forward(x, params, *, kernel_size, stride=(1, 1), padding=(0, 0),
                   dilation=(1, 1), activation="tanh", transpose_x=True):
    """Fused forward of bcnn2d (do_batchnorm=False, transpose_conv=False).

    x: (n_seeds, n_samps, C, H, W) if transpose_x else (n_samps, n_seeds, C, H, W)
    params: [(w, b)] with w: (n_seeds, C_out, C_in, KH, KW), b: (n_seeds, C_out)
    """
    kernel_size = _int2pair(kernel_size)
    stride = _int2pair(stride)
    padding = _int2pair(padding)
    dilation = _int2pair(dilation)
    assert stride[0] == stride[1], "TODO(synk): unequal strides not supported"

    if not transpose_x:
        x = jnp.swapaxes(x, 0, 1)       # tiny one-off; kernel wants seeds leading
    S, N, C_in, H, W = x.shape
    KH, KW = kernel_size

    hidden_channels = [int(w.shape[1]) for (w, _) in params]
    plan = _layer_plan(C_in, H, W, hidden_channels, kernel_size, stride, padding,
                       dilation)
    C_last, OH_L, OW_L, Wf_L = plan[-1][1], plan[-1][8], plan[-1][9], plan[-1][7]
    out_pad = ((OH_L * Wf_L + 127) // 128) * 128    # lane-dense output width

    # Flatten spatial dims outside the kernel (contiguous -> free) and repack weights
    # into per-tap (KH*KW, C_out, C_in) matrices (tiny, done once).
    x_flat = x.reshape(S, N, C_in, H * W)
    flat_params = []
    in_specs = [pl.BlockSpec((1, N, C_in, H * W), lambda s: (s, 0, 0, 0))]
    for (w, b), lp in zip(params, plan):
        lC_in, lC_out = lp[0], lp[1]
        assert int(w.shape[2]) == lC_in and int(w.shape[1]) == lC_out
        w_taps = jnp.transpose(w, (0, 3, 4, 1, 2)).reshape(S, KH * KW, lC_out, lC_in)
        b_mat = b.reshape(S, lC_out, 1)
        flat_params += [w_taps, b_mat]
        in_specs.append(pl.BlockSpec((1, KH * KW, lC_out, lC_in),
                                     lambda s: (s, 0, 0, 0)))
        in_specs.append(pl.BlockSpec((1, lC_out, 1), lambda s: (s, 0, 0)))

    # NOTE: at these sizes everything fits VMEM with large margin; for big C/H/W give
    # the flattened spatial axis its own grid dimension (halve the tile on v7x: 64 MiB
    # physical / ~32 MiB scoped VMEM vs 128 MiB on v5e/v6e).
    out = pl.pallas_call(
        partial(_bcnn_fused_kernel, plan=plan, kernel_size=kernel_size,
                stride=stride, dilation=dilation, padding=padding,
                activation=activation, n_samps=N, out_pad=out_pad),
        out_shape=jax.ShapeDtypeStruct((S, N, C_last, out_pad), x.dtype),
        grid=(S,),
        in_specs=in_specs,
        out_specs=pl.BlockSpec((1, N, C_last, out_pad), lambda s: (s, 0, 0, 0)),
        compiler_params=pltpu.CompilerParams(
            dimension_semantics=("parallel",)),     # seeds shard across TCs on v7x
    )(x_flat, *flat_params)

    # Un-flatten: valid output pixel (oh, ow) lives at lane oh*Wf_L + ow.
    out = out[..., :OH_L * Wf_L].reshape(S, N, C_last, OH_L, Wf_L)[..., :OW_L]
    if not transpose_x:
        out = jnp.swapaxes(out, 0, 1)
    return out


# ------------------------- parameter init (deterministic) -------------------------
def init_bcnn2d_params(key, n_seeds, in_channels, hidden_channels, kernel_size):
    """Replicates batch_kaiming_uniform_(a=sqrt(5)) + Conv2d bias init shapes."""
    KH, KW = kernel_size
    params = []
    c_in = in_channels
    for c_out in hidden_channels:
        key, kw_key, kb_key = jax.random.split(key, 3)
        fan_in = c_in * KH * KW
        gain = math.sqrt(2.0 / (1.0 + 5.0))          # leaky_relu gain, a=sqrt(5)
        bound_w = math.sqrt(3.0) * gain / math.sqrt(fan_in)
        w = jax.random.uniform(kw_key, (n_seeds, c_out, c_in, KH, KW),
                               minval=-bound_w, maxval=bound_w, dtype=jnp.float32)
        bound_b = 1.0 / math.sqrt(fan_in)
        b = jax.random.uniform(kb_key, (n_seeds, c_out),
                               minval=-bound_b, maxval=bound_b, dtype=jnp.float32)
        params.append((w, b))
        c_in = c_out
    return params


# --------------------------- pure-JAX reference (check) ---------------------------
def bcnn2d_reference(x, params, *, kernel_size, stride=(1, 1), padding=(0, 0),
                     dilation=(1, 1), activation="tanh", transpose_x=True):
    KH, KW = kernel_size
    if transpose_x:
        x = jnp.swapaxes(x, 0, 1)
    N, S, C, H, W = x.shape
    h = x.reshape(N, S * C, H, W)
    for w, b in params:
        c_out = w.shape[1]
        wf = w.reshape(S * c_out, w.shape[2], KH, KW)
        h = jax.lax.conv_general_dilated(
            h, wf, window_strides=stride,
            padding=[(padding[0], padding[0]), (padding[1], padding[1])],
            rhs_dilation=dilation,
            dimension_numbers=("NCHW", "OIHW", "NCHW"),
            feature_group_count=S,
            precision=jax.lax.Precision.HIGHEST)
        h = h + b.reshape(1, S * c_out, 1, 1)
        h = _ACTS[activation](h)
    Hc, Wc = h.shape[-2:]
    h = h.reshape(N, S, -1, Hc, Wc)
    if transpose_x:
        h = jnp.swapaxes(h, 0, 1)
    return h


if __name__ == "__main__":
    key = jax.random.PRNGKey(0)
    n_seeds, n_samps = 4, 2
    in_channels, H, W = 4, 16, 16
    hidden_channels = [8, 8]
    kernel_size = (3, 3)
    activation = "tanh"

    kx, kp = jax.random.split(key)
    # transpose_x=True convention: (n_seeds, n_samps, C, H, W)
    x = jax.random.normal(kx, (n_seeds, n_samps, in_channels, H, W),
                          dtype=jnp.float32)
    params = init_bcnn2d_params(kp, n_seeds, in_channels, hidden_channels,
                                kernel_size)

    out = bcnn2d_forward(x, params, kernel_size=kernel_size,
                         activation=activation, transpose_x=True)
    out = jax.block_until_ready(out)

    # expected spatial sizes: 16 -> 14 -> 12 with 3x3, stride 1, no padding
    assert out.shape == (n_seeds, n_samps, hidden_channels[-1], 12, 12), out.shape

    ref = bcnn2d_reference(x, params, kernel_size=kernel_size,
                           activation=activation, transpose_x=True)
    ref = jax.block_until_ready(ref)
    np.testing.assert_allclose(np.asarray(out), np.asarray(ref),
                               rtol=1e-4, atol=1e-4)

    print("KERNEL_OK")
</pallas_src>

<mosaic_0001>
module attributes {stable_mosaic.version = 11 : i64} {
  func.func @_bcnn_fused_kernel(%arg0: i32, %arg1: memref<1x2x4x256xf32, #tpu.memory_space<vmem>>, %arg2: memref<1x9x8x4xf32, #tpu.memory_space<vmem>>, %arg3: memref<1x8x1xf32, #tpu.memory_space<vmem>>, %arg4: memref<1x9x8x8xf32, #tpu.memory_space<vmem>>, %arg5: memref<1x8x1xf32, #tpu.memory_space<vmem>>, %arg6: memref<1x2x8x256xf32, #tpu.memory_space<vmem>>) attributes {dimension_semantics = [#tpu.dimension_semantics<parallel>], iteration_bounds = array<i64: 4>, scalar_prefetch = 0 : i64, scratch_operands = 0 : i64, tpu.core_type = #tpu.core_type<tc>, window_params = [{transform_indices = @transform_0, window_bounds = array<i64: 1, 2, 4, 256>}, {transform_indices = @transform_1, window_bounds = array<i64: 1, 9, 8, 4>}, {transform_indices = @transform_2, window_bounds = array<i64: 1, 8, 1>}, {transform_indices = @transform_3, window_bounds = array<i64: 1, 9, 8, 8>}, {transform_indices = @transform_4, window_bounds = array<i64: 1, 8, 1>}, {transform_indices = @transform_5, window_bounds = array<i64: 1, 2, 8, 256>}]} {
    %c0 = arith.constant 0 : index
    %c0_0 = arith.constant 0 : index
    %c0_1 = arith.constant 0 : index
    %c0_2 = arith.constant 0 : index
    %0 = vector.load %arg1[%c0, %c0_0, %c0_1, %c0_2] : memref<1x2x4x256xf32, #tpu.memory_space<vmem>>, vector<1x1x4x256xf32>
    %1 = vector.shape_cast %0 : vector<1x1x4x256xf32> to vector<4x256xf32>
    %c0_3 = arith.constant 0 : index
    %c1 = arith.constant 1 : index
    %c0_4 = arith.constant 0 : index
    %c0_5 = arith.constant 0 : index
    %2 = vector.load %arg1[%c0_3, %c1, %c0_4, %c0_5] : memref<1x2x4x256xf32, #tpu.memory_space<vmem>>, vector<1x1x4x256xf32>
    %3 = vector.shape_cast %2 : vector<1x1x4x256xf32> to vector<4x256xf32>
    %c0_6 = arith.constant 0 : index
    %c0_7 = arith.constant 0 : index
    %c0_8 = arith.constant 0 : index
    %c0_9 = arith.constant 0 : index
    %4 = vector.load %arg2[%c0_6, %c0_7, %c0_8, %c0_9] : memref<1x9x8x4xf32, #tpu.memory_space<vmem>>, vector<1x9x8x4xf32>
    %5 = vector.shape_cast %4 : vector<1x9x8x4xf32> to vector<9x8x4xf32>
    %c0_10 = arith.constant 0 : index
    %c0_11 = arith.constant 0 : index
    %c0_12 = arith.constant 0 : index
    %6 = vector.load %arg3[%c0_10, %c0_11, %c0_12] : memref<1x8x1xf32, #tpu.memory_space<vmem>>, vector<1x8x1xf32>
    %7 = vector.shape_cast %6 : vector<1x8x1xf32> to vector<8x1xf32>
    %8 = vector.extract_strided_slice %1 {offsets = [0, 0], sizes = [4, 222], strides = [1, 1]} : vector<4x256xf32> to vector<4x222xf32>
    %9 = vector.extract_strided_slice %5 {offsets = [0, 0, 0], sizes = [1, 8, 4], strides = [1, 1, 1]} : vector<9x8x4xf32> to vector<1x8x4xf32>
    %10 = vector.shape_cast %9 : vector<1x8x4xf32> to vector<8x4xf32>
    %cst = arith.constant dense<0.000000e+00> : vector<8x222xf32>
    %11 = tpu.matmul %10, %8, %cst {dimension_numbers = #tpu.dot_dimension_numbers<[1], [0], [0], [1], [0, 0, 1, 1], [], []>} : vector<8x4xf32>, vector<4x222xf32>, vector<8x222xf32> -> vector<8x222xf32>
    %12 = vector.extract_strided_slice %1 {offsets = [0, 1], sizes = [4, 222], strides = [1, 1]} : vector<4x256xf32> to vector<4x222xf32>
    %13 = vector.extract_strided_slice %5 {offsets = [1, 0, 0], sizes = [1, 8, 4], strides = [1, 1, 1]} : vector<9x8x4xf32> to vector<1x8x4xf32>
    %14 = vector.shape_cast %13 : vector<1x8x4xf32> to vector<8x4xf32>
    %cst_13 = arith.constant dense<0.000000e+00> : vector<8x222xf32>
    %15 = tpu.matmul %14, %12, %cst_13 {dimension_numbers = #tpu.dot_dimension_numbers<[1], [0], [0], [1], [0, 0, 1, 1], [], []>} : vector<8x4xf32>, vector<4x222xf32>, vector<8x222xf32> -> vector<8x222xf32>
    %16 = arith.addf %11, %15 : vector<8x222xf32>
    %17 = vector.extract_strided_slice %1 {offsets = [0, 2], sizes = [4, 222], strides = [1, 1]} : vector<4x256xf32> to vector<4x222xf32>
    %18 = vector.extract_strided_slice %5 {offsets = [2, 0, 0], sizes = [1, 8, 4], strides = [1, 1, 1]} : vector<9x8x4xf32> to vector<1x8x4xf32>
    %19 = vector.shape_cast %18 : vector<1x8x4xf32> to vector<8x4xf32>
    %cst_14 = arith.constant dense<0.000000e+00> : vector<8x222xf32>
    %20 = tpu.matmul %19, %17, %cst_14 {dimension_numbers = #tpu.dot_dimension_numbers<[1], [0], [0], [1], [0, 0, 1, 1], [], []>} : vector<8x4xf32>, vector<4x222xf32>, vector<8x222xf32> -> vector<8x222xf32>
    %21 = arith.addf %16, %20 : vector<8x222xf32>
    %22 = vector.extract_strided_slice %1 {offsets = [0, 16], sizes = [4, 222], strides = [1, 1]} : vector<4x256xf32> to vector<4x222xf32>
    %23 = vector.extract_strided_slice %5 {offsets = [3, 0, 0], sizes = [1, 8, 4], strides = [1, 1, 1]} : vector<9x8x4xf32> to vector<1x8x4xf32>
    %24 = vector.shape_cast %23 : vector<1x8x4xf32> to vector<8x4xf32>
    %cst_15 = arith.constant dense<0.000000e+00> : vector<8x222xf32>
    %25 = tpu.matmul %24, %22, %cst_15 {dimension_numbers = #tpu.dot_dimension_numbers<[1], [0], [0], [1], [0, 0, 1, 1], [], []>} : vector<8x4xf32>, vector<4x222xf32>, vector<8x222xf32> -> vector<8x222xf32>
    %26 = arith.addf %21, %25 : vector<8x222xf32>
    %27 = vector.extract_strided_slice %1 {offsets = [0, 17], sizes = [4, 222], strides = [1, 1]} : vector<4x256xf32> to vector<4x222xf32>
    %28 = vector.extract_strided_slice %5 {offsets = [4, 0, 0], sizes = [1, 8, 4], strides = [1, 1, 1]} : vector<9x8x4xf32> to vector<1x8x4xf32>
    %29 = vector.shape_cast %28 : vector<1x8x4xf32> to vector<8x4xf32>
    %cst_16 = arith.constant dense<0.000000e+00> : vector<8x222xf32>
    %30 = tpu.matmul %29, %27, %cst_16 {dimension_numbers = #tpu.dot_dimension_numbers<[1], [0], [0], [1], [0, 0, 1, 1], [], []>} : vector<8x4xf32>, vector<4x222xf32>, vector<8x222xf32> -> vector<8x222xf32>
    %31 = arith.addf %26, %30 : vector<8x222xf32>
    %32 = vector.extract_strided_slice %1 {offsets = [0, 18], sizes = [4, 222], strides = [1, 1]} : vector<4x256xf32> to vector<4x222xf32>
    %33 = vector.extract_strided_slice %5 {offsets = [5, 0, 0], sizes = [1, 8, 4], strides = [1, 1, 1]} : vector<9x8x4xf32> to vector<1x8x4xf32>
    %34 = vector.shape_cast %33 : vector<1x8x4xf32> to vector<8x4xf32>
    %cst_17 = arith.constant dense<0.000000e+00> : vector<8x222xf32>
    %35 = tpu.matmul %34, %32, %cst_17 {dimension_numbers = #tpu.dot_dimension_numbers<[1], [0], [0], [1], [0, 0, 1, 1], [], []>} : vector<8x4xf32>, vector<4x222xf32>, vector<8x222xf32> -> vector<8x222xf32>
    %36 = arith.addf %31, %35 : vector<8x222xf32>
    %37 = vector.extract_strided_slice %1 {offsets = [0, 32], sizes = [4, 222], strides = [1, 1]} : vector<4x256xf32> to vector<4x222xf32>
    %38 = vector.extract_strided_slice %5 {offsets = [6, 0, 0], sizes = [1, 8, 4], strides = [1, 1, 1]} : vector<9x8x4xf32> to vector<1x8x4xf32>
    %39 = vector.shape_cast %38 : vector<1x8x4xf32> to vector<8x4xf32>
    %cst_18 = arith.constant dense<0.000000e+00> : vector<8x222xf32>
    %40 = tpu.matmul %39, %37, %cst_18 {dimension_numbers = #tpu.dot_dimension_numbers<[1], [0], [0], [1], [0, 0, 1, 1], [], []>} : vector<8x4xf32>, vector<4x222xf32>, vector<8x222xf32> -> vector<8x222xf32>
    %41 = arith.addf %36, %40 : vector<8x222xf32>
    %42 = vector.extract_strided_slice %1 {offsets = [0, 33], sizes = [4, 222], strides = [1, 1]} : vector<4x256xf32> to vector<4x222xf32>
    %43 = vector.extract_strided_slice %5 {offsets = [7, 0, 0], sizes = [1, 8, 4], strides = [1, 1, 1]} : vector<9x8x4xf32> to vector<1x8x4xf32>
    %44 = vector.shape_cast %43 : vector<1x8x4xf32> to vector<8x4xf32>
    %cst_19 = arith.constant dense<0.000000e+00> : vector<8x222xf32>
    %45 = tpu.matmul %44, %42, %cst_19 {dimension_numbers = #tpu.dot_dimension_numbers<[1], [0], [0], [1], [0, 0, 1, 1], [], []>} : vector<8x4xf32>, vector<4x222xf32>, vector<8x222xf32> -> vector<8x222xf32>
    %46 = arith.addf %41, %45 : vector<8x222xf32>
    %47 = vector.extract_strided_slice %1 {offsets = [0, 34], sizes = [4, 222], strides = [1, 1]} : vector<4x256xf32> to vector<4x222xf32>
    %48 = vector.extract_strided_slice %5 {offsets = [8, 0, 0], sizes = [1, 8, 4], strides = [1, 1, 1]} : vector<9x8x4xf32> to vector<1x8x4xf32>
    %49 = vector.shape_cast %48 : vector<1x8x4xf32> to vector<8x4xf32>
    %cst_20 = arith.constant dense<0.000000e+00> : vector<8x222xf32>
    %50 = tpu.matmul %49, %47, %cst_20 {dimension_numbers = #tpu.dot_dimension_numbers<[1], [0], [0], [1], [0, 0, 1, 1], [], []>} : vector<8x4xf32>, vector<4x222xf32>, vector<8x222xf32> -> vector<8x222xf32>
    %51 = arith.addf %46, %50 : vector<8x222xf32>
    %52 = vector.broadcast %7 : vector<8x1xf32> to vector<8x222xf32>
    %53 = arith.addf %51, %52 : vector<8x222xf32>
    %54 = math.tanh %53 : vector<8x222xf32>
    %55 = vector.extract_strided_slice %3 {offsets = [0, 0], sizes = [4, 222], strides = [1, 1]} : vector<4x256xf32> to vector<4x222xf32>
    %56 = vector.extract_strided_slice %5 {offsets = [0, 0, 0], sizes = [1, 8, 4], strides = [1, 1, 1]} : vector<9x8x4xf32> to vector<1x8x4xf32>
    %57 = vector.shape_cast %56 : vector<1x8x4xf32> to vector<8x4xf32>
    %cst_21 = arith.constant dense<0.000000e+00> : vector<8x222xf32>
    %58 = tpu.matmul %57, %55, %cst_21 {dimension_numbers = #tpu.dot_dimension_numbers<[1], [0], [0], [1], [0, 0, 1, 1], [], []>} : vector<8x4xf32>, vector<4x222xf32>, vector<8x222xf32> -> vector<8x222xf32>
    %59 = vector.extract_strided_slice %3 {offsets = [0, 1], sizes = [4, 222], strides = [1, 1]} : vector<4x256xf32> to vector<4x222xf32>
    %60 = vector.extract_strided_slice %5 {offsets = [1, 0, 0], sizes = [1, 8, 4], strides = [1, 1, 1]} : vector<9x8x4xf32> to vector<1x8x4xf32>
    %61 = vector.shape_cast %60 : vector<1x8x4xf32> to vector<8x4xf32>
    %cst_22 = arith.constant dense<0.000000e+00> : vector<8x222xf32>
    %62 = tpu.matmul %61, %59, %cst_22 {dimension_numbers = #tpu.dot_dimension_numbers<[1], [0], [0], [1], [0, 0, 1, 1], [], []>} : vector<8x4xf32>, vector<4x222xf32>, vector<8x222xf32> -> vector<8x222xf32>
    %63 = arith.addf %58, %62 : vector<8x222xf32>
    %64 = vector.extract_strided_slice %3 {offsets = [0, 2], sizes = [4, 222], strides = [1, 1]} : vector<4x256xf32> to vector<4x222xf32>
    %65 = vector.extract_strided_slice %5 {offsets = [2, 0, 0], sizes = [1, 8, 4], strides = [1, 1, 1]} : vector<9x8x4xf32> to vector<1x8x4xf32>
    %66 = vector.shape_cast %65 : vector<1x8x4xf32> to vector<8x4xf32>
    %cst_23 = arith.constant dense<0.000000e+00> : vector<8x222xf32>
    %67 = tpu.matmul %66, %64, %cst_23 {dimension_numbers = #tpu.dot_dimension_numbers<[1], [0], [0], [1], [0, 0, 1, 1], [], []>} : vector<8x4xf32>, vector<4x222xf32>, vector<8x222xf32> -> vector<8x222xf32>
    %68 = arith.addf %63, %67 : vector<8x222xf32>
    %69 = vector.extract_strided_slice %3 {offsets = [0, 16], sizes = [4, 222], strides = [1, 1]} : vector<4x256xf32> to vector<4x222xf32>
    %70 = vector.extract_strided_slice %5 {offsets = [3, 0, 0], sizes = [1, 8, 4], strides = [1, 1, 1]} : vector<9x8x4xf32> to vector<1x8x4xf32>
    %71 = vector.shape_cast %70 : vector<1x8x4xf32> to vector<8x4xf32>
    %cst_24 = arith.constant dense<0.000000e+00> : vector<8x222xf32>
    %72 = tpu.matmul %71, %69, %cst_24 {dimension_numbers = #tpu.dot_dimension_numbers<[1], [0], [0], [1], [0, 0, 1, 1], [], []>} : vector<8x4xf32>, vector<4x222xf32>, vector<8x222xf32> -> vector<8x222xf32>
    %73 = arith.addf %68, %72 : vector<8x222xf32>
    %74 = vector.extract_strided_slice %3 {offsets = [0, 17], sizes = [4, 222], strides = [1, 1]} : vector<4x256xf32> to vector<4x222xf32>
    %75 = vector.extract_strided_slice %5 {offsets = [4, 0, 0], sizes = [1, 8, 4], strides = [1, 1, 1]} : vector<9x8x4xf32> to vector<1x8x4xf32>
    %76 = vector.shape_cast %75 : vector<1x8x4xf32> to vector<8x4xf32>
    %cst_25 = arith.constant dense<0.000000e+00> : vector<8x222xf32>
    %77 = tpu.matmul %76, %74, %cst_25 {dimension_numbers = #tpu.dot_dimension_numbers<[1], [0], [0], [1], [0, 0, 1, 1], [], []>} : vector<8x4xf32>, vector<4x222xf32>, vector<8x222xf32> -> vector<8x222xf32>
    %78 = arith.addf %73, %77 : vector<8x222xf32>
    %79 = vector.extract_strided_slice %3 {offsets = [0, 18], sizes = [4, 222], strides = [1, 1]} : vector<4x256xf32> to vector<4x222xf32>
    %80 = vector.extract_strided_slice %5 {offsets = [5, 0, 0], sizes = [1, 8, 4], strides = [1, 1, 1]} : vector<9x8x4xf32> to vector<1x8x4xf32>
    %81 = vector.shape_cast %80 : vector<1x8x4xf32> to vector<8x4xf32>
    %cst_26 = arith.constant dense<0.000000e+00> : vector<8x222xf32>
    %82 = tpu.matmul %81, %79, %cst_26 {dimension_numbers = #tpu.dot_dimension_numbers<[1], [0], [0], [1], [0, 0, 1, 1], [], []>} : vector<8x4xf32>, vector<4x222xf32>, vector<8x222xf32> -> vector<8x222xf32>
    %83 = arith.addf %78, %82 : vector<8x222xf32>
    %84 = vector.extract_strided_slice %3 {offsets = [0, 32], sizes = [4, 222], strides = [1, 1]} : vector<4x256xf32> to vector<4x222xf32>
    %85 = vector.extract_strided_slice %5 {offsets = [6, 0, 0], sizes = [1, 8, 4], strides = [1, 1, 1]} : vector<9x8x4xf32> to vector<1x8x4xf32>
    %86 = vector.shape_cast %85 : vector<1x8x4xf32> to vector<8x4xf32>
    %cst_27 = arith.constant dense<0.000000e+00> : vector<8x222xf32>
    %87 = tpu.matmul %86, %84, %cst_27 {dimension_numbers = #tpu.dot_dimension_numbers<[1], [0], [0], [1], [0, 0, 1, 1], [], []>} : vector<8x4xf32>, vector<4x222xf32>, vector<8x222xf32> -> vector<8x222xf32>
    %88 = arith.addf %83, %87 : vector<8x222xf32>
    %89 = vector.extract_strided_slice %3 {offsets = [0, 33], sizes = [4, 222], strides = [1, 1]} : vector<4x256xf32> to vector<4x222xf32>
    %90 = vector.extract_strided_slice %5 {offsets = [7, 0, 0], sizes = [1, 8, 4], strides = [1, 1, 1]} : vector<9x8x4xf32> to vector<1x8x4xf32>
    %91 = vector.shape_cast %90 : vector<1x8x4xf32> to vector<8x4xf32>
    %cst_28 = arith.constant dense<0.000000e+00> : vector<8x222xf32>
    %92 = tpu.matmul %91, %89, %cst_28 {dimension_numbers = #tpu.dot_dimension_numbers<[1], [0], [0], [1], [0, 0, 1, 1], [], []>} : vector<8x4xf32>, vector<4x222xf32>, vector<8x222xf32> -> vector<8x222xf32>
    %93 = arith.addf %88, %92 : vector<8x222xf32>
    %94 = vector.extract_strided_slice %3 {offsets = [0, 34], sizes = [4, 222], strides = [1, 1]} : vector<4x256xf32> to vector<4x222xf32>
    %95 = vector.extract_strided_slice %5 {offsets = [8, 0, 0], sizes = [1, 8, 4], strides = [1, 1, 1]} : vector<9x8x4xf32> to vector<1x8x4xf32>
    %96 = vector.shape_cast %95 : vector<1x8x4xf32> to vector<8x4xf32>
    %cst_29 = arith.constant dense<0.000000e+00> : vector<8x222xf32>
    %97 = tpu.matmul %96, %94, %cst_29 {dimension_numbers = #tpu.dot_dimension_numbers<[1], [0], [0], [1], [0, 0, 1, 1], [], []>} : vector<8x4xf32>, vector<4x222xf32>, vector<8x222xf32> -> vector<8x222xf32>
    %98 = arith.addf %93, %97 : vector<8x222xf32>
    %99 = vector.broadcast %7 : vector<8x1xf32> to vector<8x222xf32>
    %100 = arith.addf %98, %99 : vector<8x222xf32>
    %101 = math.tanh %100 : vector<8x222xf32>
    %c0_30 = arith.constant 0 : index
    %c0_31 = arith.constant 0 : index
    %c0_32 = arith.constant 0 : index
    %c0_33 = arith.constant 0 : index
    %102 = vector.load %arg4[%c0_30, %c0_31, %c0_32, %c0_33] : memref<1x9x8x8xf32, #tpu.memory_space<vmem>>, vector<1x9x8x8xf32>
    %103 = vector.shape_cast %102 : vector<1x9x8x8xf32> to vector<9x8x8xf32>
    %c0_34 = arith.constant 0 : index
    %c0_35 = arith.constant 0 : index
    %c0_36 = arith.constant 0 : index
    %104 = vector.load %arg5[%c0_34, %c0_35, %c0_36] : memref<1x8x1xf32, #tpu.memory_space<vmem>>, vector<1x8x1xf32>
    %105 = vector.shape_cast %104 : vector<1x8x1xf32> to vector<8x1xf32>
    %106 = vector.extract_strided_slice %54 {offsets = [0, 0], sizes = [8, 188], strides = [1, 1]} : vector<8x222xf32> to vector<8x188xf32>
    %107 = vector.extract_strided_slice %103 {offsets = [0, 0, 0], sizes = [1, 8, 8], strides = [1, 1, 1]} : vector<9x8x8xf32> to vector<1x8x8xf32>
    %108 = vector.shape_cast %107 : vector<1x8x8xf32> to vector<8x8xf32>
    %cst_37 = arith.constant dense<0.000000e+00> : vector<8x188xf32>
    %109 = tpu.matmul %108, %106, %cst_37 {dimension_numbers = #tpu.dot_dimension_numbers<[1], [0], [0], [1], [0, 0, 1, 1], [], []>} : vector<8x8xf32>, vector<8x188xf32>, vector<8x188xf32> -> vector<8x188xf32>
    %110 = vector.extract_strided_slice %54 {offsets = [0, 1], sizes = [8, 188], strides = [1, 1]} : vector<8x222xf32> to vector<8x188xf32>
    %111 = vector.extract_strided_slice %103 {offsets = [1, 0, 0], sizes = [1, 8, 8], strides = [1, 1, 1]} : vector<9x8x8xf32> to vector<1x8x8xf32>
    %112 = vector.shape_cast %111 : vector<1x8x8xf32> to vector<8x8xf32>
    %cst_38 = arith.constant dense<0.000000e+00> : vector<8x188xf32>
    %113 = tpu.matmul %112, %110, %cst_38 {dimension_numbers = #tpu.dot_dimension_numbers<[1], [0], [0], [1], [0, 0, 1, 1], [], []>} : vector<8x8xf32>, vector<8x188xf32>, vector<8x188xf32> -> vector<8x188xf32>
    %114 = arith.addf %109, %113 : vector<8x188xf32>
    %115 = vector.extract_strided_slice %54 {offsets = [0, 2], sizes = [8, 188], strides = [1, 1]} : vector<8x222xf32> to vector<8x188xf32>
    %116 = vector.extract_strided_slice %103 {offsets = [2, 0, 0], sizes = [1, 8, 8], strides = [1, 1, 1]} : vector<9x8x8xf32> to vector<1x8x8xf32>
    %117 = vector.shape_cast %116 : vector<1x8x8xf32> to vector<8x8xf32>
    %cst_39 = arith.constant dense<0.000000e+00> : vector<8x188xf32>
    %118 = tpu.matmul %117, %115, %cst_39 {dimension_numbers = #tpu.dot_dimension_numbers<[1], [0], [0], [1], [0, 0, 1, 1], [], []>} : vector<8x8xf32>, vector<8x188xf32>, vector<8x188xf32> -> vector<8x188xf32>
    %119 = arith.addf %114, %118 : vector<8x188xf32>
    %120 = vector.extract_strided_slice %54 {offsets = [0, 16], sizes = [8, 188], strides = [1, 1]} : vector<8x222xf32> to vector<8x188xf32>
    %121 = vector.extract_strided_slice %103 {offsets = [3, 0, 0], sizes = [1, 8, 8], strides = [1, 1, 1]} : vector<9x8x8xf32> to vector<1x8x8xf32>
    %122 = vector.shape_cast %121 : vector<1x8x8xf32> to vector<8x8xf32>
    %cst_40 = arith.constant dense<0.000000e+00> : vector<8x188xf32>
    %123 = tpu.matmul %122, %120, %cst_40 {dimension_numbers = #tpu.dot_dimension_numbers<[1], [0], [0], [1], [0, 0, 1, 1], [], []>} : vector<8x8xf32>, vector<8x188xf32>, vector<8x188xf32> -> vector<8x188xf32>
    %124 = arith.addf %119, %123 : vector<8x188xf32>
    %125 = vector.extract_strided_slice %54 {offsets = [0, 17], sizes = [8, 188], strides = [1, 1]} : vector<8x222xf32> to vector<8x188xf32>
    %126 = vector.extract_strided_slice %103 {offsets = [4, 0, 0], sizes = [1, 8, 8], strides = [1, 1, 1]} : vector<9x8x8xf32> to vector<1x8x8xf32>
    %127 = vector.shape_cast %126 : vector<1x8x8xf32> to vector<8x8xf32>
    %cst_41 = arith.constant dense<0.000000e+00> : vector<8x188xf32>
    %128 = tpu.matmul %127, %125, %cst_41 {dimension_numbers = #tpu.dot_dimension_numbers<[1], [0], [0], [1], [0, 0, 1, 1], [], []>} : vector<8x8xf32>, vector<8x188xf32>, vector<8x188xf32> -> vector<8x188xf32>
    %129 = arith.addf %124, %128 : vector<8x188xf32>
    %130 = vector.extract_strided_slice %54 {offsets = [0, 18], sizes = [8, 188], strides = [1, 1]} : vector<8x222xf32> to vector<8x188xf32>
    %131 = vector.extract_strided_slice %103 {offsets = [5, 0, 0], sizes = [1, 8, 8], strides = [1, 1, 1]} : vector<9x8x8xf32> to vector<1x8x8xf32>
    %132 = vector.shape_cast %131 : vector<1x8x8xf32> to vector<8x8xf32>
    %cst_42 = arith.constant dense<0.000000e+00> : vector<8x188xf32>
    %133 = tpu.matmul %132, %130, %cst_42 {dimension_numbers = #tpu.dot_dimension_numbers<[1], [0], [0], [1], [0, 0, 1, 1], [], []>} : vector<8x8xf32>, vector<8x188xf32>, vector<8x188xf32> -> vector<8x188xf32>
    %134 = arith.addf %129, %133 : vector<8x188xf32>
    %135 = vector.extract_strided_slice %54 {offsets = [0, 32], sizes = [8, 188], strides = [1, 1]} : vector<8x222xf32> to vector<8x188xf32>
    %136 = vector.extract_strided_slice %103 {offsets = [6, 0, 0], sizes = [1, 8, 8], strides = [1, 1, 1]} : vector<9x8x8xf32> to vector<1x8x8xf32>
    %137 = vector.shape_cast %136 : vector<1x8x8xf32> to vector<8x8xf32>
    %cst_43 = arith.constant dense<0.000000e+00> : vector<8x188xf32>
    %138 = tpu.matmul %137, %135, %cst_43 {dimension_numbers = #tpu.dot_dimension_numbers<[1], [0], [0], [1], [0, 0, 1, 1], [], []>} : vector<8x8xf32>, vector<8x188xf32>, vector<8x188xf32> -> vector<8x188xf32>
    %139 = arith.addf %134, %138 : vector<8x188xf32>
    %140 = vector.extract_strided_slice %54 {offsets = [0, 33], sizes = [8, 188], strides = [1, 1]} : vector<8x222xf32> to vector<8x188xf32>
    %141 = vector.extract_strided_slice %103 {offsets = [7, 0, 0], sizes = [1, 8, 8], strides = [1, 1, 1]} : vector<9x8x8xf32> to vector<1x8x8xf32>
    %142 = vector.shape_cast %141 : vector<1x8x8xf32> to vector<8x8xf32>
    %cst_44 = arith.constant dense<0.000000e+00> : vector<8x188xf32>
    %143 = tpu.matmul %142, %140, %cst_44 {dimension_numbers = #tpu.dot_dimension_numbers<[1], [0], [0], [1], [0, 0, 1, 1], [], []>} : vector<8x8xf32>, vector<8x188xf32>, vector<8x188xf32> -> vector<8x188xf32>
    %144 = arith.addf %139, %143 : vector<8x188xf32>
    %145 = vector.extract_strided_slice %54 {offsets = [0, 34], sizes = [8, 188], strides = [1, 1]} : vector<8x222xf32> to vector<8x188xf32>
    %146 = vector.extract_strided_slice %103 {offsets = [8, 0, 0], sizes = [1, 8, 8], strides = [1, 1, 1]} : vector<9x8x8xf32> to vector<1x8x8xf32>
    %147 = vector.shape_cast %146 : vector<1x8x8xf32> to vector<8x8xf32>
    %cst_45 = arith.constant dense<0.000000e+00> : vector<8x188xf32>
    %148 = tpu.matmul %147, %145, %cst_45 {dimension_numbers = #tpu.dot_dimension_numbers<[1], [0], [0], [1], [0, 0, 1, 1], [], []>} : vector<8x8xf32>, vector<8x188xf32>, vector<8x188xf32> -> vector<8x188xf32>
    %149 = arith.addf %144, %148 : vector<8x188xf32>
    %150 = vector.broadcast %105 : vector<8x1xf32> to vector<8x188xf32>
    %151 = arith.addf %149, %150 : vector<8x188xf32>
    %152 = math.tanh %151 : vector<8x188xf32>
    %153 = vector.extract_strided_slice %101 {offsets = [0, 0], sizes = [8, 188], strides = [1, 1]} : vector<8x222xf32> to vector<8x188xf32>
    %154 = vector.extract_strided_slice %103 {offsets = [0, 0, 0], sizes = [1, 8, 8], strides = [1, 1, 1]} : vector<9x8x8xf32> to vector<1x8x8xf32>
    %155 = vector.shape_cast %154 : vector<1x8x8xf32> to vector<8x8xf32>
    %cst_46 = arith.constant dense<0.000000e+00> : vector<8x188xf32>
    %156 = tpu.matmul %155, %153, %cst_46 {dimension_numbers = #tpu.dot_dimension_numbers<[1], [0], [0], [1], [0, 0, 1, 1], [], []>} : vector<8x8xf32>, vector<8x188xf32>, vector<8x188xf32> -> vector<8x188xf32>
    %157 = vector.extract_strided_slice %101 {offsets = [0, 1], sizes = [8, 188], strides = [1, 1]} : vector<8x222xf32> to vector<8x188xf32>
    %158 = vector.extract_strided_slice %103 {offsets = [1, 0, 0], sizes = [1, 8, 8], strides = [1, 1, 1]} : vector<9x8x8xf32> to vector<1x8x8xf32>
    %159 = vector.shape_cast %158 : vector<1x8x8xf32> to vector<8x8xf32>
    %cst_47 = arith.constant dense<0.000000e+00> : vector<8x188xf32>
    %160 = tpu.matmul %159, %157, %cst_47 {dimension_numbers = #tpu.dot_dimension_numbers<[1], [0], [0], [1], [0, 0, 1, 1], [], []>} : vector<8x8xf32>, vector<8x188xf32>, vector<8x188xf32> -> vector<8x188xf32>
    %161 = arith.addf %156, %160 : vector<8x188xf32>
    %162 = vector.extract_strided_slice %101 {offsets = [0, 2], sizes = [8, 188], strides = [1, 1]} : vector<8x222xf32> to vector<8x188xf32>
    %163 = vector.extract_strided_slice %103 {offsets = [2, 0, 0], sizes = [1, 8, 8], strides = [1, 1, 1]} : vector<9x8x8xf32> to vector<1x8x8xf32>
    %164 = vector.shape_cast %163 : vector<1x8x8xf32> to vector<8x8xf32>
    %cst_48 = arith.constant dense<0.000000e+00> : vector<8x188xf32>
    %165 = tpu.matmul %164, %162, %cst_48 {dimension_numbers = #tpu.dot_dimension_numbers<[1], [0], [0], [1], [0, 0, 1, 1], [], []>} : vector<8x8xf32>, vector<8x188xf32>, vector<8x188xf32> -> vector<8x188xf32>
    %166 = arith.addf %161, %165 : vector<8x188xf32>
    %167 = vector.extract_strided_slice %101 {offsets = [0, 16], sizes = [8, 188], strides = [1, 1]} : vector<8x222xf32> to vector<8x188xf32>
    %168 = vector.extract_strided_slice %103 {offsets = [3, 0, 0], sizes = [1, 8, 8], strides = [1, 1, 1]} : vector<9x8x8xf32> to vector<1x8x8xf32>
    %169 = vector.shape_cast %168 : vector<1x8x8xf32> to vector<8x8xf32>
    %cst_49 = arith.constant dense<0.000000e+00> : vector<8x188xf32>
    %170 = tpu.matmul %169, %167, %cst_49 {dimension_numbers = #tpu.dot_dimension_numbers<[1], [0], [0], [1], [0, 0, 1, 1], [], []>} : vector<8x8xf32>, vector<8x188xf32>, vector<8x188xf32> -> vector<8x188xf32>
    %171 = arith.addf %166, %170 : vector<8x188xf32>
    %172 = vector.extract_strided_slice %101 {offsets = [0, 17], sizes = [8, 188], strides = [1, 1]} : vector<8x222xf32> to vector<8x188xf32>
    %173 = vector.extract_strided_slice %103 {offsets = [4, 0, 0], sizes = [1, 8, 8], strides = [1, 1, 1]} : vector<9x8x8xf32> to vector<1x8x8xf32>
    %174 = vector.shape_cast %173 : vector<1x8x8xf32> to vector<8x8xf32>
    %cst_50 = arith.constant dense<0.000000e+00> : vector<8x188xf32>
    %175 = tpu.matmul %174, %172, %cst_50 {dimension_numbers = #tpu.dot_dimension_numbers<[1], [0], [0], [1], [0, 0, 1, 1], [], []>} : vector<8x8xf32>, vector<8x188xf32>, vector<8x188xf32> -> vector<8x188xf32>
    %176 = arith.addf %171, %175 : vector<8x188xf32>
    %177 = vector.extract_strided_slice %101 {offsets = [0, 18], sizes = [8, 188], strides = [1, 1]} : vector<8x222xf32> to vector<8x188xf32>
    %178 = vector.extract_strided_slice %103 {offsets = [5, 0, 0], sizes = [1, 8, 8], strides = [1, 1, 1]} : vector<9x8x8xf32> to vector<1x8x8xf32>
    %179 = vector.shape_cast %178 : vector<1x8x8xf32> to vector<8x8xf32>
    %cst_51 = arith.constant dense<0.000000e+00> : vector<8x188xf32>
    %180 = tpu.matmul %179, %177, %cst_51 {dimension_numbers = #tpu.dot_dimension_numbers<[1], [0], [0], [1], [0, 0, 1, 1], [], []>} : vector<8x8xf32>, vector<8x188xf32>, vector<8x188xf32> -> vector<8x188xf32>
    %181 = arith.addf %176, %180 : vector<8x188xf32>
    %182 = vector.extract_strided_slice %101 {offsets = [0, 32], sizes = [8, 188], strides = [1, 1]} : vector<8x222xf32> to vector<8x188xf32>
    %183 = vector.extract_strided_slice %103 {offsets = [6, 0, 0], sizes = [1, 8, 8], strides = [1, 1, 1]} : vector<9x8x8xf32> to vector<1x8x8xf32>
    %184 = vector.shape_cast %183 : vector<1x8x8xf32> to vector<8x8xf32>
    %cst_52 = arith.constant dense<0.000000e+00> : vector<8x188xf32>
    %185 = tpu.matmul %184, %182, %cst_52 {dimension_numbers = #tpu.dot_dimension_numbers<[1], [0], [0], [1], [0, 0, 1, 1], [], []>} : vector<8x8xf32>, vector<8x188xf32>, vector<8x188xf32> -> vector<8x188xf32>
    %186 = arith.addf %181, %185 : vector<8x188xf32>
    %187 = vector.extract_strided_slice %101 {offsets = [0, 33], sizes = [8, 188], strides = [1, 1]} : vector<8x222xf32> to vector<8x188xf32>
    %188 = vector.extract_strided_slice %103 {offsets = [7, 0, 0], sizes = [1, 8, 8], strides = [1, 1, 1]} : vector<9x8x8xf32> to vector<1x8x8xf32>
    %189 = vector.shape_cast %188 : vector<1x8x8xf32> to vector<8x8xf32>
    %cst_53 = arith.constant dense<0.000000e+00> : vector<8x188xf32>
    %190 = tpu.matmul %189, %187, %cst_53 {dimension_numbers = #tpu.dot_dimension_numbers<[1], [0], [0], [1], [0, 0, 1, 1], [], []>} : vector<8x8xf32>, vector<8x188xf32>, vector<8x188xf32> -> vector<8x188xf32>
    %191 = arith.addf %186, %190 : vector<8x188xf32>
    %192 = vector.extract_strided_slice %101 {offsets = [0, 34], sizes = [8, 188], strides = [1, 1]} : vector<8x222xf32> to vector<8x188xf32>
    %193 = vector.extract_strided_slice %103 {offsets = [8, 0, 0], sizes = [1, 8, 8], strides = [1, 1, 1]} : vector<9x8x8xf32> to vector<1x8x8xf32>
    %194 = vector.shape_cast %193 : vector<1x8x8xf32> to vector<8x8xf32>
    %cst_54 = arith.constant dense<0.000000e+00> : vector<8x188xf32>
    %195 = tpu.matmul %194, %192, %cst_54 {dimension_numbers = #tpu.dot_dimension_numbers<[1], [0], [0], [1], [0, 0, 1, 1], [], []>} : vector<8x8xf32>, vector<8x188xf32>, vector<8x188xf32> -> vector<8x188xf32>
    %196 = arith.addf %191, %195 : vector<8x188xf32>
    %197 = vector.broadcast %105 : vector<8x1xf32> to vector<8x188xf32>
    %198 = arith.addf %196, %197 : vector<8x188xf32>
    %199 = math.tanh %198 : vector<8x188xf32>
    %cst_55 = arith.constant 0.000000e+00 : f32
    %200 = vector.broadcast %cst_55 : f32 to vector<8x68xf32>
    %201 = tpu.concatenate %152, %200 in 1 : vector<8x188xf32>, vector<8x68xf32> -> vector<8x256xf32>
    %c0_56 = arith.constant 0 : index
    %c0_57 = arith.constant 0 : index
    %c0_58 = arith.constant 0 : index
    %c0_59 = arith.constant 0 : index
    %202 = vector.load %arg6[%c0_56, %c0_57, %c0_58, %c0_59] : memref<1x2x8x256xf32, #tpu.memory_space<vmem>>, vector<1x1x8x256xf32>
    %203 = vector.shape_cast %202 : vector<1x1x8x256xf32> to vector<8x256xf32>
    %204 = vector.shape_cast %201 : vector<8x256xf32> to vector<1x1x8x256xf32>
    tpu.vector_store %arg6[%c0_56, %c0_57, %c0_58, %c0_59], %204 {strides = array<i32>} : memref<1x2x8x256xf32, #tpu.memory_space<vmem>>, vector<1x1x8x256xf32>,
    %cst_60 = arith.constant 0.000000e+00 : f32
    %205 = vector.broadcast %cst_60 : f32 to vector<8x68xf32>
    %206 = tpu.concatenate %199, %205 in 1 : vector<8x188xf32>, vector<8x68xf32> -> vector<8x256xf32>
    %c0_61 = arith.constant 0 : index
    %c1_62 = arith.constant 1 : index
    %c0_63 = arith.constant 0 : index
    %c0_64 = arith.constant 0 : index
    %207 = vector.load %arg6[%c0_61, %c1_62, %c0_63, %c0_64] : memref<1x2x8x256xf32, #tpu.memory_space<vmem>>, vector<1x1x8x256xf32>
    %208 = vector.shape_cast %207 : vector<1x1x8x256xf32> to vector<8x256xf32>
    %209 = vector.shape_cast %206 : vector<8x256xf32> to vector<1x1x8x256xf32>
    tpu.vector_store %arg6[%c0_61, %c1_62, %c0_63, %c0_64], %209 {strides = array<i32>} : memref<1x2x8x256xf32, #tpu.memory_space<vmem>>, vector<1x1x8x256xf32>,
    return
  }
  func.func @transform_0(%arg0: i32) -> (i32, i32, i32, i32) {
    %c0_i32 = arith.constant 0 : i32
    %c0_i32_0 = arith.constant 0 : i32
    %c0_i32_1 = arith.constant 0 : i32
    %c0_i32_2 = arith.constant 0 : i32
    return %arg0, %c0_i32, %c0_i32_0, %c0_i32_1 : i32, i32, i32, i32
  }
  func.func @transform_1(%arg0: i32) -> (i32, i32, i32, i32) {
    %c0_i32 = arith.constant 0 : i32
    %c0_i32_0 = arith.constant 0 : i32
    %c0_i32_1 = arith.constant 0 : i32
    %c0_i32_2 = arith.constant 0 : i32
    return %arg0, %c0_i32, %c0_i32_0, %c0_i32_1 : i32, i32, i32, i32
  }
  func.func @transform_2(%arg0: i32) -> (i32, i32, i32) {
    %c0_i32 = arith.constant 0 : i32
    %c0_i32_0 = arith.constant 0 : i32
    %c0_i32_1 = arith.constant 0 : i32
    return %arg0, %c0_i32, %c0_i32_0 : i32, i32, i32
  }
  func.func @transform_3(%arg0: i32) -> (i32, i32, i32, i32) {
    %c0_i32 = arith.constant 0 : i32
    %c0_i32_0 = arith.constant 0 : i32
    %c0_i32_1 = arith.constant 0 : i32
    %c0_i32_2 = arith.constant 0 : i32
    return %arg0, %c0_i32, %c0_i32_0, %c0_i32_1 : i32, i32, i32, i32
  }
  func.func @transform_4(%arg0: i32) -> (i32, i32, i32) {
    %c0_i32 = arith.constant 0 : i32
    %c0_i32_0 = arith.constant 0 : i32
    %c0_i32_1 = arith.constant 0 : i32
    return %arg0, %c0_i32, %c0_i32_0 : i32, i32, i32
  }
  func.func @transform_5(%arg0: i32) -> (i32, i32, i32, i32) {
    %c0_i32 = arith.constant 0 : i32
    %c0_i32_0 = arith.constant 0 : i32
    %c0_i32_1 = arith.constant 0 : i32
    %c0_i32_2 = arith.constant 0 : i32
    return %arg0, %c0_i32, %c0_i32_0, %c0_i32_1 : i32, i32, i32, i32
  }
}

</mosaic_0001>

<bundles_post_ra>
// kernel: tpu_custom_call.1
= control target key start
LH: loop header
LB: loop body
LE: loop exit
PB: predicated region body
PF: predicated region fallthrough
CT: control target
= control target key end

     0   :  { %10 = vsyncpa [#allocation3], 0  ;;  %s4153_s0 = inlined_call_operand.vmem [shape: f32[4,2,4,256], index: 0, kind: input, shape index: {}]   ;;  %s4154_s1 = inlined_call_operand.vmem [shape: f32[4,9,8,4], index: 1, kind: input, shape index: {}]   ;;  %s4155_s2 = inlined_call_operand.vmem [shape: f32[4,8,1], index: 2, kind: input, shape index: {}]   ;;  %s4156_s3 = inlined_call_operand.vmem [shape: f32[4,9,8,8], index: 3, kind: input, shape index: {}]   ;;  %s4157_s4 = inlined_call_operand.vmem [shape: f32[4,8,1], index: 4, kind: input, shape index: {}]   ;;  %s4158_s5 = inlined_call_operand.hbm [shape: f32[4,2,8,256], index: 5, kind: output, shape index: {}]  }
   0x1   :  { %12 = vsyncpa [#allocation3 + $0x1], 0  ;;  %s3762_s18 = smov 0   ;;  %s3764_s19 = smov 0  }
   0x2   :  { %s3766_s20 = smov 0   ;;  %s3768_s21 = smov 0  }
   0x3 LB: > { %s3783_s22 = sadd.s32 4294967295, %s3717_s21   ;;  %s3427_s23 = sadd.s32 4294967294, %s3717_s21   ;;  %s3717_s21 = sphi %s3768_s21, %s4167_s21   ;;  %s3713_s20 = sphi %s3766_s20, %s4166_s20   ;;  %s3709_s19 = sphi %s3764_s19, %s4165_s19   ;;  %s3705_s18 = sphi %s3762_s18, %s4164_s18  }
   0x4   : > { %s3787_s24 = sadd.s32 1, %s3717_s21   ;;  %s155_s25 = sadd.s32 1, %s3713_s20 }
   0x5   : > { %s152_s26 = ssub.s32 %s3717_s21, %s3787_s24  ;;  %p165_p0 = scmp.ne.s32.totalorder %s3713_s20, %s3709_s19 }
   0x6   : > { %p153_p1 = scmp.eq.s32.totalorder %s152_s26, 0  ;;  %p166_p2 = scmp.eq.s32.totalorder %s3783_s22, 3 }
   0x7   : > { %p171_p3 = scmp.ne.s32.totalorder %s3709_s19, %s3705_s18  ;;  %p172_p4 = scmp.eq.s32.totalorder %s3427_s23, 3 }
   0x8   : > { %s3798_s27 = scalar_select %p153_p1, %s3713_s20, %s155_s25  }
   0x9   : > { %p3800_p5 = por %p166_p2, %p165_p0  ;;  %p3804_p6 = por %p172_p4, %p171_p3 }
   0xa   : > { %p3430_p7 = scmp.ge.s32.totalorder %s3717_s21, 1  ;;  %p228_p8 = scmp.lt.s32.totalorder %s3717_s21, 5 }
   0xc   : > { %p229_p9 = pnand %p3430_p7, %p228_p8 }
   0xd   : > { %p274_p10 = scmp.lt.s32.totalorder (!%p229_p9), %s3783_s22, 3  ;;  %v3719_v0 = vmov (!%p229_p9), 0.0   ;;  %s3720_s10 = smov (!%p229_p9), 127   ;;  %v3728_v5 = vmov (!%p229_p9), 0   ;;  %vm322_vm0 = vcmask (!%p229_p9), 1043456   ;;  %vm316_vm1 = vcmask (!%p229_p9), 1039360  }
   0xe   : > { %232 = sbr.rel (%p229_p9) target bundleno = 867 (0x363), region = 40  ;;  %391 = vmatprep.mubr.f32.mxu0 (!%p229_p9), %v3719_v0  ;;  %1162 = vmatprep.mubr.f32.mxu1 (!%p229_p9), %v3719_v0  ;;  %s3721_s11 = smov (!%p229_p9), 126   ;;  %vm318_vm2 = vcmask (!%p229_p9), 31744   ;;  %vm480_vm3 = vcmask (!%p229_p9), 1031168   ;;  %vm566_vm4 = vcmask (!%p229_p9), 916480   ;;  %vm652_vm5 = vcmask (!%p229_p9), 908288  }
   0xf   : > { %s3722_s12 = smov (!%p229_p9), 112   ;;  %s3723_s13 = smov (!%p229_p9), 111   ;;  %3636 = vset.pattern.permute.xlu0 (!%p229_p9), %v3728_v5  ;;  %vm738_vm6 = vcmask (!%p229_p9), 900096   ;;  %vm824_vm7 = vcmask (!%p229_p9), 785408   ;;  %vm910_vm8 = vcmask (!%p229_p9), 777216   ;;  %vm996_vm9 = vcmask (!%p229_p9), 769024  }
  0x10   : > { %s3724_s14 = smov (!%p229_p9), 110   ;;  %s3725_s15 = smov (!%p229_p9), 96   ;;  %vm1841_vm10 = vcmask (!%p229_p9), 64512   ;;  %vm3295_vm11 = vcmask (!%p229_p9), 490496  }
  0x11   : > { %s4159_s16 = smov (!%p229_p9), 95   ;;  %s3727_s17 = smov (!%p229_p9), 94  }
  0x12   : > { %s3519_s25 = sshll.u32 (!%p229_p9), %s3783_s22, 9 }
  0x13   : > { %s4108_s8 = scalar_lea.hbm (!%p229_p9), %s4158_s5, %s3519_s25 }
  0x15   : > { %s3814_s30 = scalar_select %p274_p10, %s3783_s22, 3 }
  0x17   : > { %s3518_s6 = sshll.u32 %s3814_s30, 4  ;;  %s3435_s23 = sshll.u32 %s3814_s30, 3 }
  0x18   : > { %s278_s9 = scalar_lea.vmem %s4153_s0, %s3518_s6  ;;  %s287_s6 = scalar_lea.vmem %s4155_s2, %s3435_s23 }
  0x19   : > { %v3820_v1 = vld [vmem:[%s278_s9 + $0x8] sm:$0xff]  ;;  %v3822_v2 = vld [vmem:[%s278_s9] sm:$0xff]  ;;  %s3584_s7 = smul.u32 72, %s3814_s30  ;;  %s271_s30 = sand.u32 1, %s3709_s19  }
  0x1a   : > { %1089 = vrot.lane.b32.xlu1 %v3820_v1, %s3720_s10  ;;  %312 = vrot.lane.b32.xlu0 %v3822_v2, %s3720_s10  ;;  %v3830_v3 = vcombine.high %v3820_v1, %v3820_v1  ;;  %v311_v4 = vcombine.high %v3822_v2, %v3822_v2  ;;  %v309_v6 = vld [vmem:[%s287_s6] sm:$0xff]  ;;  %s4112_s9 = scalar_lea.sflag [#allocation3], %s271_s30 }
  0x1e   : > { %1091 = vrot.lane.b32.xlu1 %v3830_v3, %s3720_s10  ;;  %314 = vrot.lane.b32.xlu0 %v311_v4, %s3720_s10 }
  0x22   : > { %478 = vrot.lane.b32.xlu1 %v311_v4, %s3721_s11  ;;  %476 = vrot.lane.b32.xlu0 %v3822_v2, %s3721_s11 }
  0x26   : > { %1246 = vrot.lane.b32.xlu1 %v3830_v3, %s3721_s11  ;;  %1244 = vrot.lane.b32.xlu0 %v3820_v1, %s3721_s11 }
  0x2a   : > { %564 = vrot.lane.b32.xlu1 %v311_v4, %s3722_s12  ;;  %562 = vrot.lane.b32.xlu0 %v3822_v2, %s3722_s12 }
  0x2e   : > { %1328 = vrot.lane.b32.xlu1 %v3830_v3, %s3722_s12  ;;  %1326 = vrot.lane.b32.xlu0 %v3820_v1, %s3722_s12 }
  0x32   : > { %650 = vrot.lane.b32.xlu1 %v311_v4, %s3723_s13  ;;  %648 = vrot.lane.b32.xlu0 %v3822_v2, %s3723_s13 }
  0x36   : > { %1410 = vrot.lane.b32.xlu1 %v3830_v3, %s3723_s13  ;;  %1408 = vrot.lane.b32.xlu0 %v3820_v1, %s3723_s13 }
  0x3a   : > { %736 = vrot.lane.b32.xlu1 %v311_v4, %s3724_s14  ;;  %734 = vrot.lane.b32.xlu0 %v3822_v2, %s3724_s14 }
  0x3e   : > { %1492 = vrot.lane.b32.xlu1 %v3830_v3, %s3724_s14  ;;  %1490 = vrot.lane.b32.xlu0 %v3820_v1, %s3724_s14 }
  0x42   : > { %822 = vrot.lane.b32.xlu1 %v311_v4, %s3725_s15  ;;  %820 = vrot.lane.b32.xlu0 %v3822_v2, %s3725_s15 }
  0x46   : > { %1574 = vrot.lane.b32.xlu1 %v3830_v3, %s3725_s15  ;;  %1572 = vrot.lane.b32.xlu0 %v3820_v1, %s3725_s15 }
  0x4a   : > { %908 = vrot.lane.b32.xlu1 %v311_v4, %s4159_s16  ;;  %906 = vrot.lane.b32.xlu0 %v3822_v2, %s4159_s16 }
  0x4e   : > { %1656 = vrot.lane.b32.xlu1 %v3830_v3, %s4159_s16  ;;  %1654 = vrot.lane.b32.xlu0 %v3820_v1, %s4159_s16  ;;  %s3898_s16 = scalar_lea.vmem %s4154_s1, %s3584_s7 }
  0x4f   : > { %v301_v11 = vld [vmem:[%s3898_s16 + $0x8] sm:$0xff]  ;;  %v300_v16 = vld [vmem:[%s3898_s16] sm:$0xff]  ;;  %v302_v23 = vld [vmem:[%s3898_s16 + $0x10] sm:$0xff] }
  0x50   : > { %v303_v30 = vld [vmem:[%s3898_s16 + $0x18] sm:$0xff]  ;;  %v304_v37 = vld [vmem:[%s3898_s16 + $0x20] sm:$0xff]  ;;  %v305_v44 = vld [vmem:[%s3898_s16 + $0x28] sm:$0xff] }
  0x51   : > { %v306_v51 = vld [vmem:[%s3898_s16 + $0x30] sm:$0xff]  ;;  %v307_v58 = vld [vmem:[%s3898_s16 + $0x38] sm:$0xff]  ;;  %v308_v63 = vld [vmem:[%s3898_s16 + $0x40] sm:$0xff]  ;;  %s4042_s16 = scalar_lea.vmem %s4156_s3, %s3584_s7 }
  0x52   : > { %994 = vrot.lane.b32.xlu1 %v311_v4, %s3727_s17  ;;  %992 = vrot.lane.b32.xlu0 %v3822_v2, %s3727_s17 }
  0x56   : > { %1738 = vrot.lane.b32.xlu1 %v3830_v3, %s3727_s17  ;;  %1736 = vrot.lane.b32.xlu0 %v3820_v1, %s3727_s17 }
  0x5a   : > { %1080 = vperm.xlu0 %3636, %v309_v6  }
  0x8c   : > { %v1090_v7 = vpop.permute.xlu1 %1089  ;;  %v313_v8 = vpop.permute.xlu0 %312 }
  0x90   : > { %v1092_v9 = vpop.permute.xlu1 %1091  ;;  %v315_v10 = vpop.permute.xlu0 %314 }
  0x91   : > { %3439 = vmatprep.subr.msk.mxu0 %vm322_vm0, %v315_v10  ;;  %3466 = vmatprep.subr.msk.mxu1 %vm322_vm0, %v1092_v9  ;;  %v317_v12 = vsel %vm316_vm1, %v313_v8, %v315_v10  ;;  %v1093_v13 = vsel %vm316_vm1, %v1090_v7, %v1092_v9 }
  0x92   : > { %3440 = vmatpush1.msk.msra.mxu0 %vm322_vm0, %v317_v12  ;;  %3467 = vmatpush1.msk.msra.mxu1 %vm322_vm0, %v1093_v13 }
  0x93   : > { %3441 = vmatmul.mubr.msk.f32.vlgmr.msra.gmra.mrb[0].mxu0 %vm318_vm2, %v301_v11  ;;  %3468 = vmatmul.mubr.msk.f32.vlgmr.msra.gmra.mrb[0].mxu1 %vm318_vm2, %v301_v11 }
  0x94   : > { %3442 = vmatprep.subr.msk.mxu0 %vm322_vm0, %v311_v4  ;;  %3469 = vmatprep.subr.msk.mxu1 %vm322_vm0, %v3830_v3  ;;  %v479_v14 = vpop.permute.xlu1 %478  ;;  %v477_v15 = vpop.permute.xlu0 %476 }
  0x95   : > { %3443 = vmatpush1.msk.msra.mxu0 %vm322_vm0, %v3822_v2  ;;  %469 = vmatprep.mubr.f32.mxu0 %v3719_v0  ;;  %v481_v19 = vsel %vm480_vm3, %v477_v15, %v479_v14 }
  0x96   : > { %3470 = vmatpush1.msk.msra.mxu1 %vm322_vm0, %v3820_v1  ;;  %1237 = vmatprep.mubr.f32.mxu1 %v3719_v0 }
  0x97   : > { %3445 = vmatprep.subr.msk.mxu0 %vm322_vm0, %v479_v14 }
  0x98   : > { %v1247_v17 = vpop.permute.xlu1 %1246  ;;  %v1245_v18 = vpop.permute.xlu0 %1244 }
  0x99   : > { %3472 = vmatprep.subr.msk.mxu1 %vm322_vm0, %v1247_v17  ;;  %v1248_v20 = vsel %vm480_vm3, %v1245_v18, %v1247_v17  ;;  %v1823_v18 = vld [vmem:[%s4042_s16 + $0x8] sm:$0xff] }
  0x9b   : > { %3444 = vmatmul.mubr.msk.f32.vlgmr.msra.gmra.mrb[0].mxu0 %vm318_vm2, %v300_v16  ;;  %3471 = vmatmul.mubr.msk.f32.vlgmr.msra.gmra.mrb[0].mxu1 %vm318_vm2, %v300_v16 }
  0x9c   : > { %3446 = vmatpush1.msk.msra.mxu0 %vm322_vm0, %v481_v19  ;;  %553 = vmatprep.mubr.f32.mxu0 %v3719_v0  ;;  %v565_v21 = vpop.permute.xlu1 %564  ;;  %v563_v22 = vpop.permute.xlu0 %562 }
  0x9d   : > { %3473 = vmatpush1.msk.msra.mxu1 %vm322_vm0, %v1248_v20  ;;  %1317 = vmatprep.mubr.f32.mxu1 %v3719_v0  ;;  %v567_v26 = vsel %vm566_vm4, %v563_v22, %v565_v21 }
  0x9e   : > { %3448 = vmatprep.subr.msk.mxu0 %vm322_vm0, %v565_v21 }
  0xa0   : > { %v1329_v24 = vpop.permute.xlu1 %1328  ;;  %v1327_v25 = vpop.permute.xlu0 %1326 }
  0xa1   : > { %3475 = vmatprep.subr.msk.mxu1 %vm322_vm0, %v1329_v24  ;;  %v1330_v27 = vsel %vm566_vm4, %v1327_v25, %v1329_v24  ;;  %v1822_v25 = vld [vmem:[%s4042_s16] sm:$0xff] }
  0xa3   : > { %3447 = vmatmul.mubr.msk.f32.vlgmr.msra.gmra.mrb[0].mxu0 %vm318_vm2, %v302_v23  ;;  %3474 = vmatmul.mubr.msk.f32.vlgmr.msra.gmra.mrb[0].mxu1 %vm318_vm2, %v302_v23 }
  0xa4   : > { %3449 = vmatpush1.msk.msra.mxu0 %vm322_vm0, %v567_v26  ;;  %639 = vmatprep.mubr.f32.mxu0 %v3719_v0  ;;  %v651_v28 = vpop.permute.xlu1 %650  ;;  %v649_v29 = vpop.permute.xlu0 %648 }
  0xa5   : > { %3476 = vmatpush1.msk.msra.mxu1 %vm322_vm0, %v1330_v27  ;;  %1399 = vmatprep.mubr.f32.mxu1 %v3719_v0  ;;  %v653_v33 = vsel %vm652_vm5, %v649_v29, %v651_v28 }
  0xa6   : > { %3451 = vmatprep.subr.msk.mxu0 %vm322_vm0, %v651_v28 }
  0xa8   : > { %v1411_v31 = vpop.permute.xlu1 %1410  ;;  %v1409_v32 = vpop.permute.xlu0 %1408 }
  0xa9   : > { %3478 = vmatprep.subr.msk.mxu1 %vm322_vm0, %v1411_v31  ;;  %v1412_v34 = vsel %vm652_vm5, %v1409_v32, %v1411_v31  ;;  %v1824_v32 = vld [vmem:[%s4042_s16 + $0x10] sm:$0xff] }
  0xab   : > { %3450 = vmatmul.mubr.msk.f32.vlgmr.msra.gmra.mrb[0].mxu0 %vm318_vm2, %v303_v30  ;;  %3477 = vmatmul.mubr.msk.f32.vlgmr.msra.gmra.mrb[0].mxu1 %vm318_vm2, %v303_v30 }
  0xac   : > { %3452 = vmatpush1.msk.msra.mxu0 %vm322_vm0, %v653_v33  ;;  %725 = vmatprep.mubr.f32.mxu0 %v3719_v0  ;;  %v737_v35 = vpop.permute.xlu1 %736  ;;  %v735_v36 = vpop.permute.xlu0 %734 }
  0xad   : > { %3479 = vmatpush1.msk.msra.mxu1 %vm322_vm0, %v1412_v34  ;;  %1481 = vmatprep.mubr.f32.mxu1 %v3719_v0  ;;  %v739_v40 = vsel %vm738_vm6, %v735_v36, %v737_v35 }
  0xae   : > { %3454 = vmatprep.subr.msk.mxu0 %vm322_vm0, %v737_v35 }
  0xb0   : > { %v1493_v38 = vpop.permute.xlu1 %1492  ;;  %v1491_v39 = vpop.permute.xlu0 %1490 }
  0xb1   : > { %3481 = vmatprep.subr.msk.mxu1 %vm322_vm0, %v1493_v38  ;;  %v1494_v41 = vsel %vm738_vm6, %v1491_v39, %v1493_v38  ;;  %v1825_v39 = vld [vmem:[%s4042_s16 + $0x18] sm:$0xff] }
  0xb3   : > { %3453 = vmatmul.mubr.msk.f32.vlgmr.msra.gmra.mrb[0].mxu0 %vm318_vm2, %v304_v37  ;;  %3480 = vmatmul.mubr.msk.f32.vlgmr.msra.gmra.mrb[0].mxu1 %vm318_vm2, %v304_v37 }
  0xb4   : > { %3455 = vmatpush1.msk.msra.mxu0 %vm322_vm0, %v739_v40  ;;  %811 = vmatprep.mubr.f32.mxu0 %v3719_v0  ;;  %v823_v42 = vpop.permute.xlu1 %822  ;;  %v821_v43 = vpop.permute.xlu0 %820 }
  0xb5   : > { %3482 = vmatpush1.msk.msra.mxu1 %vm322_vm0, %v1494_v41  ;;  %1563 = vmatprep.mubr.f32.mxu1 %v3719_v0  ;;  %v825_v47 = vsel %vm824_vm7, %v821_v43, %v823_v42 }
  0xb6   : > { %3457 = vmatprep.subr.msk.mxu0 %vm322_vm0, %v823_v42 }
  0xb8   : > { %v1575_v45 = vpop.permute.xlu1 %1574  ;;  %v1573_v46 = vpop.permute.xlu0 %1572 }
  0xb9   : > { %3484 = vmatprep.subr.msk.mxu1 %vm322_vm0, %v1575_v45  ;;  %v1576_v48 = vsel %vm824_vm7, %v1573_v46, %v1575_v45  ;;  %v1826_v46 = vld [vmem:[%s4042_s16 + $0x20] sm:$0xff] }
  0xbb   : > { %3456 = vmatmul.mubr.msk.f32.vlgmr.msra.gmra.mrb[0].mxu0 %vm318_vm2, %v305_v44  ;;  %3483 = vmatmul.mubr.msk.f32.vlgmr.msra.gmra.mrb[0].mxu1 %vm318_vm2, %v305_v44 }
  0xbc   : > { %3458 = vmatpush1.msk.msra.mxu0 %vm322_vm0, %v825_v47  ;;  %897 = vmatprep.mubr.f32.mxu0 %v3719_v0  ;;  %v909_v49 = vpop.permute.xlu1 %908  ;;  %v907_v50 = vpop.permute.xlu0 %906 }
  0xbd   : > { %3485 = vmatpush1.msk.msra.mxu1 %vm322_vm0, %v1576_v48  ;;  %1645 = vmatprep.mubr.f32.mxu1 %v3719_v0  ;;  %v911_v54 = vsel %vm910_vm8, %v907_v50, %v909_v49 }
  0xbe   : > { %3460 = vmatprep.subr.msk.mxu0 %vm322_vm0, %v909_v49 }
  0xc0   : > { %v1657_v52 = vpop.permute.xlu1 %1656  ;;  %v1655_v53 = vpop.permute.xlu0 %1654 }
  0xc1   : > { %3487 = vmatprep.subr.msk.mxu1 %vm322_vm0, %v1657_v52  ;;  %v1658_v55 = vsel %vm910_vm8, %v1655_v53, %v1657_v52  ;;  %v1827_v53 = vld [vmem:[%s4042_s16 + $0x28] sm:$0xff] }
  0xc3   : > { %3459 = vmatmul.mubr.msk.f32.vlgmr.msra.gmra.mrb[0].mxu0 %vm318_vm2, %v306_v51  ;;  %3486 = vmatmul.mubr.msk.f32.vlgmr.msra.gmra.mrb[0].mxu1 %vm318_vm2, %v306_v51 }
  0xc4   : > { %3461 = vmatpush1.msk.msra.mxu0 %vm322_vm0, %v911_v54  ;;  %983 = vmatprep.mubr.f32.mxu0 %v3719_v0  ;;  %v995_v56 = vpop.permute.xlu1 %994  ;;  %v993_v57 = vpop.permute.xlu0 %992 }
  0xc5   : > { %3488 = vmatpush1.msk.msra.mxu1 %vm322_vm0, %v1658_v55  ;;  %1727 = vmatprep.mubr.f32.mxu1 %v3719_v0  ;;  %v997_v61 = vsel %vm996_vm9, %v993_v57, %v995_v56 }
  0xc6   : > { %3463 = vmatprep.subr.msk.mxu0 %vm322_vm0, %v995_v56 }
  0xc8   : > { %v1739_v59 = vpop.permute.xlu1 %1738  ;;  %v1737_v60 = vpop.permute.xlu0 %1736 }
  0xc9   : > { %3490 = vmatprep.subr.msk.mxu1 %vm322_vm0, %v1739_v59  ;;  %v1740_v62 = vsel %vm996_vm9, %v1737_v60, %v1739_v59  ;;  %v1828_v60 = vld [vmem:[%s4042_s16 + $0x30] sm:$0xff] }
  0xcb   : > { %3462 = vmatmul.mubr.msk.f32.vlgmr.msra.gmra.mrb[0].mxu0 %vm318_vm2, %v307_v58  ;;  %3489 = vmatmul.mubr.msk.f32.vlgmr.msra.gmra.mrb[0].mxu1 %vm318_vm2, %v307_v58 }
  0xcc   : > { %3464 = vmatpush1.msk.msra.mxu0 %vm322_vm0, %v997_v61  ;;  %1069 = vmatprep.mubr.f32.mxu0 %v3719_v0 }
  0xcd   : > { %3491 = vmatpush1.msk.msra.mxu1 %vm322_vm0, %v1740_v62  ;;  %1809 = vmatprep.mubr.f32.mxu1 %v3719_v0 }
  0xd3   : > { %3465 = vmatmul.mubr.msk.f32.vlgmr.msra.gmra.mrb[0].mxu0 %vm318_vm2, %v308_v63  ;;  %3492 = vmatmul.mubr.msk.f32.vlgmr.msra.gmra.mrb[0].mxu1 %vm318_vm2, %v308_v63 }
  0xd4   : > { %1909 = vmatprep.mubr.f32.mxu0 %v3719_v0  ;;  %2653 = vmatprep.mubr.f32.mxu1 %v3719_v0 }
  0xd9   : > { %v1081_v1 = vpop.permute.xlu0 %1080 }
 0x1a6   : > { %v1071_v2 = vpop.f32.mrb[0].mxu0  ;;  %v1811_v3 = vpop.f32.mrb[0].mxu1 }
 0x1a7   : > { %v1083_v4 = vadd.f32 %v1081_v1, %v1071_v2  ;;  %v1818_v5 = vadd.f32 %v1811_v3, %v1081_v1  ;;  %v1073_v6 = vpop.f32.mrb[1].mxu0  ;;  %v1813_v7 = vpop.f32.mrb[1].mxu1  ;;  %v1829_v3 = vld [vmem:[%s4042_s16 + $0x38] sm:$0xff] }
 0x1a8   : > { %v1084_v8 = vadd.f32 %v1081_v1, %v1073_v6  ;;  %v1819_v9 = vadd.f32 %v1813_v7, %v1081_v1 }
 0x1a9   : > { %3639 = vtanh.f32 %v1083_v4 }
 0x1aa   : > { %3641 = vtanh.f32 %v1818_v5 }
 0x1ab   : > { %3643 = vtanh.f32 %v1084_v8  ;;  %v1830_v8 = vld [vmem:[%s4042_s16 + $0x40] sm:$0xff] }
 0x1ac   : > { %3645 = vtanh.f32 %v1819_v9 }
 0x1b3   : > { %v3640_v10 = vpop.eup %3639 }
 0x1b4   : > { %v3642_v11 = vpop.eup %3641  ;;  %1834 = vrot.lane.b32.xlu1 %v3640_v10, %s3720_s10 }
 0x1b5   : > { %2582 = vrot.lane.b32.xlu0 %v3642_v11, %s3720_s10  ;;  %v3644_v12 = vpop.eup %3643 }
 0x1b6   : > { %v3646_v13 = vpop.eup %3645 }
 0x1b8   : > { %1836 = vrot.lane.b32.xlu1 %v3644_v12, %s3720_s10 }
 0x1b9   : > { %1990 = vrot.lane.b32.xlu0 %v3640_v10, %s3721_s11 }
 0x1bc   : > { %2584 = vrot.lane.b32.xlu1 %v3646_v13, %s3720_s10  ;;  %s4163_s10 = smov 95  }
 0x1bd   : > { %2731 = vrot.lane.b32.xlu0 %v3642_v11, %s3721_s11 }
 0x1c0   : > { %1992 = vrot.lane.b32.xlu1 %v3644_v12, %s3721_s11 }
 0x1c1   : > { %2073 = vrot.lane.b32.xlu0 %v3640_v10, %s3722_s12 }
 0x1c4   : > { %2733 = vrot.lane.b32.xlu1 %v3646_v13, %s3721_s11 }
 0x1c5   : > { %2811 = vrot.lane.b32.xlu0 %v3642_v11, %s3722_s12 }
 0x1c8   : > { %2075 = vrot.lane.b32.xlu1 %v3644_v12, %s3722_s12 }
 0x1c9   : > { %2156 = vrot.lane.b32.xlu0 %v3640_v10, %s3723_s13 }
 0x1cc   : > { %2813 = vrot.lane.b32.xlu1 %v3646_v13, %s3722_s12 }
 0x1cd   : > { %2891 = vrot.lane.b32.xlu0 %v3642_v11, %s3723_s13 }
 0x1d0   : > { %2158 = vrot.lane.b32.xlu1 %v3644_v12, %s3723_s13 }
 0x1d1   : > { %2239 = vrot.lane.b32.xlu0 %v3640_v10, %s3724_s14 }
 0x1d4   : > { %2893 = vrot.lane.b32.xlu1 %v3646_v13, %s3723_s13  ;;  %s296_s13 = scalar_lea.vmem %s4157_s4, %s3435_s23 }
 0x1d5   : > { %2971 = vrot.lane.b32.xlu0 %v3642_v11, %s3724_s14  ;;  %v1831_v14 = vld [vmem:[%s296_s13] sm:$0xff] }
 0x1d8   : > { %2241 = vrot.lane.b32.xlu1 %v3644_v12, %s3724_s14 }
 0x1d9   : > { %2322 = vrot.lane.b32.xlu0 %v3640_v10, %s3725_s15 }
 0x1dc   : > { %2973 = vrot.lane.b32.xlu1 %v3646_v13, %s3724_s14 }
 0x1dd   : > { %3051 = vrot.lane.b32.xlu0 %v3642_v11, %s3725_s15 }
 0x1e0   : > { %2324 = vrot.lane.b32.xlu1 %v3644_v12, %s3725_s15 }
 0x1e1   : > { %2405 = vrot.lane.b32.xlu0 %v3640_v10, %s4163_s10 }
 0x1e4   : > { %3053 = vrot.lane.b32.xlu1 %v3646_v13, %s3725_s15 }
 0x1e5   : > { %3131 = vrot.lane.b32.xlu0 %v3642_v11, %s4163_s10 }
 0x1e8   : > { %2407 = vrot.lane.b32.xlu1 %v3644_v12, %s4163_s10 }
 0x1e9   : > { %2488 = vrot.lane.b32.xlu0 %v3640_v10, %s3727_s17 }
 0x1ec   : > { %3133 = vrot.lane.b32.xlu1 %v3646_v13, %s4163_s10  ;;  %s3729_s10 = smov [#allocation2]  }
 0x1ed   : > { %3211 = vrot.lane.b32.xlu0 %v3642_v11, %s3727_s17  ;;  %s3659_s11 = sshll.u32 %s3729_s10, 4  ;;  %s3660_s11 = int_to_ptr.vmem [resolvable:$false] %s3659_s11 }
 0x1ee   : > { %s3661_s12 = scalar_lea.vmem %s3660_s11, 1024 }
 0x1f0   : > { %2490 = vrot.lane.b32.xlu1 %v3644_v12, %s3727_s17 }
 0x1f1   : > { %2573 = vperm.xlu0 %3636, %v1831_v14  }
 0x1f4   : > { %3213 = vrot.lane.b32.xlu1 %v3646_v13, %s3727_s17  ;;  %s3431_s17 = sshll.u32 %s271_s30, 5 }
 0x1f5   : > { %s273_s23 = scalar_lea.vmem [#allocation2], %s3431_s17 }
 0x1f6   : > { %s3317_s26 = sshll.u32 %s273_s23, 4  ;;  %s4110_s26 = int_to_ptr.vmem [resolvable:$true] %s3317_s26 }
 0x1f7   : > { %s3655_s22 = scalar_lea.vmem %s4110_s26, 512  ;;  %p3662_p0 = scmp.lt.s32.totalorder %s4110_s26, %s3660_s11 }
 0x1f8   : > { %p3656_p11 = scmp.ne.s32.totalorder %s4110_s26, %s3655_s22  ;;  %p3663_p1 = scmp.lt.s32.totalorder %s3661_s12, %s3655_s22 }
 0x1fa   : > { %p3657_p12 = pnand %p3656_p11, %p3800_p5  ;;  %p3664_p2 = por %p3663_p1, %p3662_p0 }
 0x1fc   : > { %p3658_p13 = pneg %p3657_p12 }
 0x1fe   : > { %p3665_p3 = pnand %p3664_p2, %p3658_p13 }
 0x226   : > { %v1835_v15 = vpop.permute.xlu1 %1834 }
 0x227   : > { %v2583_v16 = vpop.permute.xlu0 %2582 }
 0x22a   : > { %v1837_v17 = vpop.permute.xlu1 %1836 }
 0x22b   : > { %v1838_v19 = vsel %vm316_vm1, %v1835_v15, %v1837_v17  ;;  %v1991_v20 = vpop.permute.xlu0 %1990  ;;  %1845 = vmatprep.subr.mxu0 %v1837_v17 }
 0x22c   : > { %1846 = vmatpush1.msra.mxu0 %v1838_v19 }
 0x22d   : > { %3493 = vmatmul.mubr.msk.f32.vlgmr.msra.gmra.mrb[2].mxu0 %vm1841_vm10, %v1823_v18  ;;  %1919 = vmatprep.subr.mxu0 %v3644_v12 }
 0x22e   : > { %1920 = vmatpush1.msra.mxu0 %v3640_v10  ;;  %v2585_v21 = vpop.permute.xlu1 %2584  ;;  %1983 = vmatprep.mubr.f32.mxu0 %v3719_v0 }
 0x22f   : > { %v2586_v22 = vsel %vm316_vm1, %v2583_v16, %v2585_v21  ;;  %v2732_v23 = vpop.permute.xlu0 %2731  ;;  %2589 = vmatprep.subr.mxu1 %v2585_v21 }
 0x230   : > { %2590 = vmatpush1.msra.mxu1 %v2586_v22 }
 0x231   : > { %3502 = vmatmul.mubr.msk.f32.vlgmr.msra.gmra.mrb[2].mxu1 %vm1841_vm10, %v1823_v18  ;;  %2660 = vmatprep.subr.mxu1 %v3646_v13 }
 0x232   : > { %v1993_v24 = vpop.permute.xlu1 %1992  ;;  %2661 = vmatpush1.msra.mxu1 %v3642_v11  ;;  %2724 = vmatprep.mubr.f32.mxu1 %v3719_v0 }
 0x233   : > { %v1994_v26 = vsel %vm480_vm3, %v1991_v20, %v1993_v24  ;;  %v2074_v27 = vpop.permute.xlu0 %2073  ;;  %2000 = vmatprep.subr.mxu0 %v1993_v24 }
 0x235   : > { %3494 = vmatmul.mubr.msk.f32.vlgmr.msra.gmra.mrb[2].mxu0 %vm1841_vm10, %v1822_v25 }
 0x236   : > { %2001 = vmatpush1.msra.mxu0 %v1994_v26  ;;  %v2734_v28 = vpop.permute.xlu1 %2733  ;;  %2064 = vmatprep.mubr.f32.mxu0 %v3719_v0 }
 0x237   : > { %v2735_v29 = vsel %vm480_vm3, %v2732_v23, %v2734_v28  ;;  %v2812_v30 = vpop.permute.xlu0 %2811  ;;  %2738 = vmatprep.subr.mxu1 %v2734_v28 }
 0x239   : > { %3503 = vmatmul.mubr.msk.f32.vlgmr.msra.gmra.mrb[2].mxu1 %vm1841_vm10, %v1822_v25 }
 0x23a   : > { %2739 = vmatpush1.msra.mxu1 %v2735_v29  ;;  %v2076_v31 = vpop.permute.xlu1 %2075  ;;  %2802 = vmatprep.mubr.f32.mxu1 %v3719_v0 }
 0x23b   : > { %v2077_v33 = vsel %vm566_vm4, %v2074_v27, %v2076_v31  ;;  %v2157_v34 = vpop.permute.xlu0 %2156  ;;  %2083 = vmatprep.subr.mxu0 %v2076_v31 }
 0x23d   : > { %3495 = vmatmul.mubr.msk.f32.vlgmr.msra.gmra.mrb[2].mxu0 %vm1841_vm10, %v1824_v32 }
 0x23e   : > { %2084 = vmatpush1.msra.mxu0 %v2077_v33  ;;  %v2814_v35 = vpop.permute.xlu1 %2813  ;;  %2147 = vmatprep.mubr.f32.mxu0 %v3719_v0 }
 0x23f   : > { %v2815_v36 = vsel %vm566_vm4, %v2812_v30, %v2814_v35  ;;  %v2892_v37 = vpop.permute.xlu0 %2891  ;;  %2818 = vmatprep.subr.mxu1 %v2814_v35 }
 0x241   : > { %3504 = vmatmul.mubr.msk.f32.vlgmr.msra.gmra.mrb[2].mxu1 %vm1841_vm10, %v1824_v32 }
 0x242   : > { %2819 = vmatpush1.msra.mxu1 %v2815_v36  ;;  %v2159_v38 = vpop.permute.xlu1 %2158  ;;  %2882 = vmatprep.mubr.f32.mxu1 %v3719_v0 }
 0x243   : > { %v2160_v40 = vsel %vm652_vm5, %v2157_v34, %v2159_v38  ;;  %v2240_v41 = vpop.permute.xlu0 %2239  ;;  %2166 = vmatprep.subr.mxu0 %v2159_v38 }
 0x245   : > { %3496 = vmatmul.mubr.msk.f32.vlgmr.msra.gmra.mrb[2].mxu0 %vm1841_vm10, %v1825_v39 }
 0x246   : > { %2167 = vmatpush1.msra.mxu0 %v2160_v40  ;;  %v2894_v42 = vpop.permute.xlu1 %2893  ;;  %2230 = vmatprep.mubr.f32.mxu0 %v3719_v0 }
 0x247   : > { %v2895_v43 = vsel %vm652_vm5, %v2892_v37, %v2894_v42  ;;  %v2972_v44 = vpop.permute.xlu0 %2971  ;;  %2898 = vmatprep.subr.mxu1 %v2894_v42 }
 0x249   : > { %3505 = vmatmul.mubr.msk.f32.vlgmr.msra.gmra.mrb[2].mxu1 %vm1841_vm10, %v1825_v39 }
 0x24a   : > { %2899 = vmatpush1.msra.mxu1 %v2895_v43  ;;  %v2242_v45 = vpop.permute.xlu1 %2241  ;;  %2962 = vmatprep.mubr.f32.mxu1 %v3719_v0 }
 0x24b   : > { %v2243_v47 = vsel %vm738_vm6, %v2240_v41, %v2242_v45  ;;  %v2323_v48 = vpop.permute.xlu0 %2322  ;;  %2249 = vmatprep.subr.mxu0 %v2242_v45 }
 0x24d   : > { %3497 = vmatmul.mubr.msk.f32.vlgmr.msra.gmra.mrb[2].mxu0 %vm1841_vm10, %v1826_v46 }
 0x24e   : > { %2250 = vmatpush1.msra.mxu0 %v2243_v47  ;;  %v2974_v49 = vpop.permute.xlu1 %2973  ;;  %2313 = vmatprep.mubr.f32.mxu0 %v3719_v0 }
 0x24f   : > { %v2975_v50 = vsel %vm738_vm6, %v2972_v44, %v2974_v49  ;;  %v3052_v51 = vpop.permute.xlu0 %3051  ;;  %2978 = vmatprep.subr.mxu1 %v2974_v49 }
 0x251   : > { %3506 = vmatmul.mubr.msk.f32.vlgmr.msra.gmra.mrb[2].mxu1 %vm1841_vm10, %v1826_v46 }
 0x252   : > { %2979 = vmatpush1.msra.mxu1 %v2975_v50  ;;  %v2325_v52 = vpop.permute.xlu1 %2324  ;;  %3042 = vmatprep.mubr.f32.mxu1 %v3719_v0 }
 0x253   : > { %v2326_v54 = vsel %vm824_vm7, %v2323_v48, %v2325_v52  ;;  %2332 = vmatprep.subr.mxu0 %v2325_v52  ;;  %v2406_v55 = vpop.permute.xlu0 %2405 }
 0x255   : > { %3498 = vmatmul.mubr.msk.f32.vlgmr.msra.gmra.mrb[2].mxu0 %vm1841_vm10, %v1827_v53 }
 0x256   : > { %2333 = vmatpush1.msra.mxu0 %v2326_v54  ;;  %v3054_v56 = vpop.permute.xlu1 %3053  ;;  %2396 = vmatprep.mubr.f32.mxu0 %v3719_v0 }
 0x257   : > { %v3055_v57 = vsel %vm824_vm7, %v3052_v51, %v3054_v56  ;;  %3058 = vmatprep.subr.mxu1 %v3054_v56  ;;  %v3132_v58 = vpop.permute.xlu0 %3131 }
 0x259   : > { %3507 = vmatmul.mubr.msk.f32.vlgmr.msra.gmra.mrb[2].mxu1 %vm1841_vm10, %v1827_v53 }
 0x25a   : > { %3059 = vmatpush1.msra.mxu1 %v3055_v57  ;;  %v2408_v59 = vpop.permute.xlu1 %2407  ;;  %3122 = vmatprep.mubr.f32.mxu1 %v3719_v0 }
 0x25b   : > { %v2409_v61 = vsel %vm910_vm8, %v2406_v55, %v2408_v59  ;;  %2415 = vmatprep.subr.mxu0 %v2408_v59  ;;  %v2489_v1 = vpop.permute.xlu0 %2488 }
 0x25d   : > { %3499 = vmatmul.mubr.msk.f32.vlgmr.msra.gmra.mrb[2].mxu0 %vm1841_vm10, %v1828_v60 }
 0x25e   : > { %2416 = vmatpush1.msra.mxu0 %v2409_v61  ;;  %v3134_v62 = vpop.permute.xlu1 %3133  ;;  %2479 = vmatprep.mubr.f32.mxu0 %v3719_v0 }
 0x25f   : > { %v3135_v63 = vsel %vm910_vm8, %v3132_v58, %v3134_v62  ;;  %3138 = vmatprep.subr.mxu1 %v3134_v62  ;;  %v3212_v5 = vpop.permute.xlu0 %3211 }
 0x261   : > { %3508 = vmatmul.mubr.msk.f32.vlgmr.msra.gmra.mrb[2].mxu1 %vm1841_vm10, %v1828_v60 }
 0x262   : > { %3139 = vmatpush1.msra.mxu1 %v3135_v63  ;;  %v2491_v2 = vpop.permute.xlu1 %2490  ;;  %3202 = vmatprep.mubr.f32.mxu1 %v3719_v0 }
 0x263   : > { %v2492_v4 = vsel %vm996_vm9, %v2489_v1, %v2491_v2  ;;  %2498 = vmatprep.subr.mxu0 %v2491_v2 }
 0x265   : > { %3500 = vmatmul.mubr.msk.f32.vlgmr.msra.gmra.mrb[2].mxu0 %vm1841_vm10, %v1829_v3 }
 0x266   : > { %2499 = vmatpush1.msra.mxu0 %v2492_v4  ;;  %v3214_v6 = vpop.permute.xlu1 %3213  ;;  %2562 = vmatprep.mubr.f32.mxu0 %v3719_v0 }
 0x267   : > { %v3215_v7 = vsel %vm996_vm9, %v3212_v5, %v3214_v6  ;;  %3218 = vmatprep.subr.mxu1 %v3214_v6 }
 0x269   : > { %3509 = vmatmul.mubr.msk.f32.vlgmr.msra.gmra.mrb[2].mxu1 %vm1841_vm10, %v1829_v3 }
 0x26a   : > { %3219 = vmatpush1.msra.mxu1 %v3215_v7  ;;  %3282 = vmatprep.mubr.f32.mxu1 %v3719_v0 }
 0x26d   : > { %3501 = vmatmul.mubr.msk.f32.vlgmr.msra.gmra.mrb[2].mxu0 %vm1841_vm10, %v1830_v8 }
 0x270   : > { %v2574_v9 = vpop.permute.xlu0 %2573 }
 0x271   : > { %3510 = vmatmul.mubr.msk.f32.vlgmr.msra.gmra.mrb[2].mxu1 %vm1841_vm10, %v1830_v8 }
 0x340   : > { %v2564_v10 = vpop.f32.mrb[2].mxu0 }
 0x341   : > { %v2576_v11 = vadd.f32 %v2574_v9, %v2564_v10  ;;  %v2566_v12 = vpop.f32.mrb[3].mxu0 }
 0x342   : > { %v2577_v13 = vadd.f32 %v2574_v9, %v2566_v12 }
 0x343   : > { %3647 = vtanh.f32 %v2576_v11 }
 0x344   : > { %3649 = vtanh.f32 %v2577_v13  ;;  %v3284_v14 = vpop.f32.mrb[2].mxu1 }
 0x345   : > { %v3291_v15 = vadd.f32 %v3284_v14, %v2574_v9  ;;  %v3286_v16 = vpop.f32.mrb[3].mxu1 }
 0x346   : > { %v3292_v17 = vadd.f32 %v3286_v16, %v2574_v9 }
 0x347   : > { %3651 = vtanh.f32 %v3291_v15 }
 0x348   : > { %3653 = vtanh.f32 %v3292_v17 }
 0x34d   : > { %v3648_v0 = vpop.eup %3647 }
 0x34e   : > { %v3650_v18 = vpop.eup %3649  ;;  %3297 = vst [vmem:[%s273_s23] sm:$0xff] %v3648_v0 }
 0x34f   : > { %v3296_v19 = vsel %vm3295_vm11, %v3650_v18, 0.0 }
 0x350   : > { %3298 = vst [vmem:[%s273_s23 + $0x8] sm:$0xff] %v3296_v19 }
 0x351   : > { %v3652_v20 = vpop.eup %3651 }
 0x352   : > { %v3654_v21 = vpop.eup %3653  ;;  %3511 = vst [vmem:[%s273_s23 + $0x10] sm:$0xff] %v3652_v20 }
 0x353   : > { %v3299_v22 = vsel %vm3295_vm11, %v3654_v21, 0.0 }
 0x354   : > { %3512 = vst [vmem:[%s273_s23 + $0x18] sm:$0xff] %v3299_v22 }
 0x355   : > { %3668 = shalt.err (!%p3665_p3)
}
 0x356   : > { %s3669_s13 = scalar_lea.hbm %s4108_s8, 512  ;;  %s3673_s16 = scalar_lea.hbm %s4158_s5, 2048 }
 0x357   : > { %p3670_p4 = scmp.ne.s32.totalorder %s4108_s8, %s3669_s13  ;;  %p3674_p9 = scmp.lt.u32.totalorder %s4108_s8, %s4158_s5 }
 0x358   : > { %p3675_p10 = scmp.lt.u32.totalorder %s3673_s16, %s3669_s13  ;;  %p3677_p12 = scmp.lt.u32.totalorder %s3669_s13, %s4108_s8 }
 0x359   : > { %p3671_p7 = pnand %p3670_p4, %p3800_p5 }
 0x35a   : > { %p3676_p11 = por %p3675_p10, %p3674_p9 }
 0x35b   : > { %p3672_p8 = pneg %p3671_p7 }
 0x35c   : > { %p3678_p13 = por %p3677_p12, %p3676_p11 }
 0x35e   : > { %p3679_p0 = pnand %p3678_p13, %p3672_p8 }
 0x360   : > { %3682 = shalt.err (!%p3679_p0)
}
 0x361   : > { %s3730_s23 = smov 256   ;;  %s3731_s25 = smov 16  }
 0x362   : > { %3585 = dma.vmem_to_hbm [thread:$0]  (%p3800_p5), %s4110_s26, 512, %s4108_s8, %s4112_s9, %s3730_s23, %s3730_s23, %s3731_s25  }
 0x363 PF: > { %p3591_p1 = scmp.ge.s32.totalorder %s3717_s21, 2  ;;  %s3332_s6 = sand.u32 1, %s3705_s18  }
 0x364   : > { %s3333_s7 = scalar_lea.sflag [#allocation3], %s3332_s6 }
 0x365   : > { %p3588_p2 = pnand %p3591_p1, %p3804_p6 }
 0x367   : > { %3700 = dma.done.wait (!%p3588_p2), %s3333_s7, 512  }
 0x368   : > { %3702 = vsyncadd (!%p3588_p2), %s3333_s7, 4294966784  ;;  %p15_p3 = scmp.ge.s32.totalorder %s3787_s24, 6   ;;  %s4164_s18 = smov %s3709_s19 }
 0x369   : > { %s4165_s19 = smov %s3713_s20  ;;  %s4166_s20 = smov %s3798_s27 }
 0x36a   : > { %s4167_s21 = smov %s3787_s24  ;;  %17 = sbr.rel (!%p15_p3) target bundleno = 3 (0x3), region = 89 }
 0x371   :  { %3338 = vsyncpa [#allocation3], 1 }
 0x372   :  { %3340 = vsyncpa [#allocation3 + $0x1], 1 }

</bundles_post_ra>
